<compile_context>
chip_gen: v6e
topology: v6e:2x2x1
jax: 0.10.0
libtpu: 0.0.40
codegen_flags: <defaults>
</compile_context>

<pallas_src>
import jax
import jax.numpy as jnp
from jax.experimental import pallas as pl
from jax.experimental.pallas import tpu as pltpu


# ----------------------------------------------------------------------------
# Fused Pallas kernel: all LSTM layers (wavefront) + linear head
# ----------------------------------------------------------------------------
def make_fused_lstm_kernel(num_layers, T, H, B_tile):
    G = 4 * H
    L = num_layers

    def kernel(*refs):
        # Inputs: x, then 5 refs per layer, then linear head; 1 output; 1 scratch.
        x_ref = refs[0]
        layer_refs = refs[1:1 + 5 * L]
        w_lin_ref = refs[1 + 5 * L]        # (H, O_pad)  bf16
        b_lin_ref = refs[2 + 5 * L]        # (1, O_pad)  f32
        out_ref = refs[3 + 5 * L]          # (B_tile, O_pad) f32
        xproj_ref = refs[4 + 5 * L]        # (T, B_tile, 4H) f32 VMEM scratch

        # -------- Load weights once; pre-broadcast biases outside loops -----
        w_ih, w_hh, b_full, hs, cs = [], [], [], [], []
        for l in range(L):
            w_ih_ref, w_hh_ref, b_ref, h0_ref, c0_ref = layer_refs[5 * l:5 * l + 5]
            w_ih.append(w_ih_ref[...])                  # (I_l, 4H) bf16
            w_hh.append(w_hh_ref[...])                  # (H, 4H)  bf16
            if l == 0:
                b_full.append(b_ref[...])               # folded into x-proj
            else:
                b_full.append(jnp.broadcast_to(b_ref[...], (B_tile, G)))
            hs.append(h0_ref[...])                      # (B_tile, H) f32
            cs.append(c0_ref[...])

        # -------- Hoisted input projection for layer 0 (one big matmul) -----
        x2d = x_ref[...].reshape(T * B_tile, x_ref.shape[-1]).astype(jnp.bfloat16)
        proj = jnp.dot(x2d, w_ih[0], preferred_element_type=jnp.float32)
        xproj_ref[...] = (proj + b_full[0]).reshape(T, B_tile, G)

        # -------- Cell update: full-vreg activations when H < 128 -----------
        def cell_update(gates, c_prev):
            if H < 128:
                sig = jax.nn.sigmoid(gates)             # full-vreg EUP op
                th = jnp.tanh(gates)                    # full-vreg EUP op
                i_g = sig[:, 0 * H:1 * H]
                f_g = sig[:, 1 * H:2 * H]
                g_g = th[:, 2 * H:3 * H]
                o_g = sig[:, 3 * H:4 * H]
            else:                                       # tile-aligned slices
                i_g = jax.nn.sigmoid(gates[:, 0 * H:1 * H])
                f_g = jax.nn.sigmoid(gates[:, 1 * H:2 * H])
                g_g = jnp.tanh(gates[:, 2 * H:3 * H])
                o_g = jax.nn.sigmoid(gates[:, 3 * H:4 * H])
            c_new = f_g * c_prev + i_g * g_g
            h_new = o_g * jnp.tanh(c_new)
            return h_new, c_new

        def layer0_step(t, h_prev, c_prev):
            gates = xproj_ref[t] + jnp.dot(
                h_prev.astype(jnp.bfloat16), w_hh[0],
                preferred_element_type=jnp.float32)
            return cell_update(gates, c_prev)

        def layerl_step(l, h_below, h_prev, c_prev):
            gates = (jnp.dot(h_below.astype(jnp.bfloat16), w_ih[l],
                             preferred_element_type=jnp.float32)
                     + jnp.dot(h_prev.astype(jnp.bfloat16), w_hh[l],
                               preferred_element_type=jnp.float32)
                     + b_full[l])
            return cell_update(gates, c_prev)

        # -------- Wavefront schedule over (layer, time) ----------------------
        # Layer l at wavefront step s processes time t = s - l.  Everything it
        # needs (h_{l-1}[t], h_l[t-1], c_l[t-1]) is exactly the carry entering
        # step s, so all active layers advance concurrently (reads use OLD
        # carries only; new values are committed at the end of the step).
        def do_step(s, hs_old, cs_old, active):
            new_hs, new_cs = list(hs_old), list(cs_old)
            for l in range(L):
                if not active[l]:
                    continue
                if l == 0:
                    h_n, c_n = layer0_step(s, hs_old[0], cs_old[0])
                else:
                    h_n, c_n = layerl_step(l, hs_old[l - 1], hs_old[l], cs_old[l])
                new_hs[l], new_cs[l] = h_n, c_n
            return new_hs, new_cs

        # Prologue: s = 0 .. L-2 (only the leading layers have work yet).
        for s in range(L - 1):
            act = [0 <= s - l <= T - 1 for l in range(L)]
            hs, cs = do_step(s, hs, cs, act)

        # Steady state: s = L-1 .. T-1, every layer active (bounded unroll).
        steady_lo, steady_hi = L - 1, T
        if steady_hi > steady_lo:
            def body(s, carry):
                hs_c, cs_c = carry
                nh, nc = do_step(s, hs_c, cs_c, [True] * L)
                return (tuple(nh), tuple(nc))

            steady_len = steady_hi - steady_lo
            hs_t, cs_t = jax.lax.fori_loop(
                steady_lo, steady_hi, body, (tuple(hs), tuple(cs)),
                unroll=min(steady_len, 8))
            hs, cs = list(hs_t), list(cs_t)

        # Epilogue: s = max(L-1, T) .. T+L-2 (trailing layers drain).
        for s in range(max(L - 1, T), T + L - 1):
            act = [0 <= s - l <= T - 1 for l in range(L)]
            hs, cs = do_step(s, hs, cs, act)

        # -------- Linear head on the top layer's final hidden state ----------
        out_ref[...] = (
            jnp.dot(hs[L - 1].astype(jnp.bfloat16), w_lin_ref[...],
                    preferred_element_type=jnp.float32)
            + b_lin_ref[...]).astype(out_ref.dtype)

    return kernel


# ----------------------------------------------------------------------------
# Wrapper
# ----------------------------------------------------------------------------
@jax.jit
def lstm_forward(input_seq, params, h0, c0):
    """Replicates:
         output, _ = lstm(input_seq, (h0, c0))   # batch_first
         pred = linear(output)[:, -1, :]
    input_seq: (B, T, input_size).  Returns (B, output_size).
    """
    B, T, _ = input_seq.shape
    H = h0.shape[-1]
    L = len(params["lstm"])
    O = params["linear"]["w_t"].shape[-1]

    # Batch padded to a multiple of the tile; grid axis shards batch tiles.
    B_tile = 8
    B_pad = max(B_tile, ((B + B_tile - 1) // B_tile) * B_tile)
    n_btiles = B_pad // B_tile
    pad = B_pad - B

    # Lane-dense output slab (avoid masked vst on a width-1 output).
    O_pad = ((O + 127) // 128) * 128

    x = jnp.transpose(input_seq, (1, 0, 2))          # (T, B, I) time-major
    if pad:
        x = jnp.pad(x, ((0, 0), (0, pad), (0, 0)))
        h0 = jnp.pad(h0, ((0, 0), (0, pad), (0, 0)))
        c0 = jnp.pad(c0, ((0, 0), (0, pad), (0, 0)))

    w_lin = params["linear"]["w_t"]                  # (H, O)
    b_lin = params["linear"]["b"]                    # (1, O)
    if O_pad != O:
        w_lin = jnp.pad(w_lin, ((0, 0), (0, O_pad - O)))
        b_lin = jnp.pad(b_lin, ((0, 0), (0, O_pad - O)))
    w_lin = w_lin.astype(jnp.bfloat16)               # bf16 MXU operand

    args = [x]
    in_specs = [pl.BlockSpec((T, B_tile, x.shape[-1]), lambda bt: (0, bt, 0))]
    for l, p in enumerate(params["lstm"]):
        w_ih_b = p["w_ih_t"].astype(jnp.bfloat16)    # (I_l, 4H)
        w_hh_b = p["w_hh_t"].astype(jnp.bfloat16)    # (H, 4H)
        bias = p["b"]                                # (1, 4H) f32
        args += [w_ih_b, w_hh_b, bias, h0[l], c0[l]]
        in_specs += [
            pl.BlockSpec(tuple(w_ih_b.shape), lambda bt: (0, 0)),
            pl.BlockSpec(tuple(w_hh_b.shape), lambda bt: (0, 0)),
            pl.BlockSpec(tuple(bias.shape), lambda bt: (0, 0)),
            pl.BlockSpec((B_tile, H), lambda bt: (bt, 0)),
            pl.BlockSpec((B_tile, H), lambda bt: (bt, 0)),
        ]
    args += [w_lin, b_lin]
    in_specs += [pl.BlockSpec(tuple(w_lin.shape), lambda bt: (0, 0)),
                 pl.BlockSpec(tuple(b_lin.shape), lambda bt: (0, 0))]

    kernel = make_fused_lstm_kernel(L, T, H, B_tile)
    pred_pad = pl.pallas_call(
        kernel,
        out_shape=jax.ShapeDtypeStruct((B_pad, O_pad), jnp.float32),
        grid_spec=pltpu.PrefetchScalarGridSpec(
            num_scalar_prefetch=0,
            grid=(n_btiles,),
            in_specs=in_specs,
            out_specs=pl.BlockSpec((B_tile, O_pad), lambda bt: (bt, 0)),
            scratch_shapes=[pltpu.VMEM((T, B_tile, 4 * H), jnp.float32)],
        ),
        compiler_params=pltpu.CompilerParams(
            dimension_semantics=("parallel",),
            vmem_limit_bytes=32 * 1024 * 1024),
    )(*args)
    return pred_pad[:B, :O]


# ----------------------------------------------------------------------------
# Deterministic parameter init (PyTorch-style U(-1/sqrt(H), 1/sqrt(H)))
# ----------------------------------------------------------------------------
def init_params(key, input_size, hidden_size, num_layers, output_size):
    bound = 1.0 / jnp.sqrt(jnp.float32(hidden_size))
    lstm_params = []
    for layer in range(num_layers):
        in_sz = input_size if layer == 0 else hidden_size
        key, k1, k2, k3, k4 = jax.random.split(key, 5)
        w_ih = jax.random.uniform(k1, (4 * hidden_size, in_sz),
                                  jnp.float32, -bound, bound)
        w_hh = jax.random.uniform(k2, (4 * hidden_size, hidden_size),
                                  jnp.float32, -bound, bound)
        b_ih = jax.random.uniform(k3, (4 * hidden_size,),
                                  jnp.float32, -bound, bound)
        b_hh = jax.random.uniform(k4, (4 * hidden_size,),
                                  jnp.float32, -bound, bound)
        # Gate order i, f, g, o (PyTorch).  Weights kept split (W_ih / W_hh).
        lstm_params.append({
            "w_ih_t": w_ih.T,                                    # (in, 4H)
            "w_hh_t": w_hh.T,                                    # (H, 4H)
            "b": (b_ih + b_hh).reshape(1, 4 * hidden_size),      # (1, 4H)
        })
    key, k5, k6 = jax.random.split(key, 3)
    w_l = jax.random.uniform(k5, (output_size, hidden_size),
                             jnp.float32, -bound, bound)
    b_l = jax.random.uniform(k6, (output_size,),
                             jnp.float32, -bound, bound)
    return {
        "lstm": lstm_params,
        "linear": {"w_t": w_l.T, "b": b_l.reshape(1, output_size)},
    }


# ----------------------------------------------------------------------------
# Pure-JAX f32 reference (for correctness check)
# ----------------------------------------------------------------------------
def reference_forward(input_seq, params, h0, c0):
    x = jnp.transpose(input_seq, (1, 0, 2))  # (T, B, I)
    H = h0.shape[-1]
    for layer, p in enumerate(params["lstm"]):

        def step(carry, x_t, p=p, H=H):
            h, c = carry
            gates = x_t @ p["w_ih_t"] + h @ p["w_hh_t"] + p["b"]
            i = jax.nn.sigmoid(gates[:, 0 * H:1 * H])
            f = jax.nn.sigmoid(gates[:, 1 * H:2 * H])
            g = jnp.tanh(gates[:, 2 * H:3 * H])
            o = jax.nn.sigmoid(gates[:, 3 * H:4 * H])
            c_new = f * c + i * g
            h_new = o * jnp.tanh(c_new)
            return (h_new, c_new), h_new

        (_, _), hs = jax.lax.scan(step, (h0[layer], c0[layer]), x)
        x = hs
    return x[-1] @ params["linear"]["w_t"] + params["linear"]["b"]


# ----------------------------------------------------------------------------
if __name__ == "__main__":
    input_size = 4
    hidden_size = 32
    num_layers = 2
    output_size = 1
    batch_size = 2
    seq_len = 8

    key = jax.random.PRNGKey(0)
    k_params, k_x, k_h, k_c = jax.random.split(key, 4)

    params = init_params(k_params, input_size, hidden_size,
                         num_layers, output_size)

    input_seq = jax.random.normal(
        k_x, (batch_size, seq_len, input_size), jnp.float32)
    # PyTorch forward uses torch.randn for h_0/c_0; generate deterministically.
    h0 = jax.random.normal(k_h, (num_layers, batch_size, hidden_size),
                           jnp.float32)
    c0 = jax.random.normal(k_c, (num_layers, batch_size, hidden_size),
                           jnp.float32)

    pred = lstm_forward(input_seq, params, h0, c0)
    pred = jax.block_until_ready(pred)

    ref = reference_forward(input_seq, params, h0, c0)
    assert pred.shape == (batch_size, output_size)
    # Tolerance accounts for bf16 MXU operands (f32 accumulation) compounded
    # over the T-step recurrence; reference is pure f32.
    assert jnp.allclose(pred, ref, atol=2e-2, rtol=2e-2), (
        f"mismatch: {pred} vs {ref}")

    print("KERNEL_OK")
</pallas_src>

<mosaic_0001>
module attributes {stable_mosaic.version = 11 : i64} {
  func.func @kernel(%arg0: i32, %arg1: memref<8x8x4xf32, #tpu.memory_space<vmem>>, %arg2: memref<4x128xbf16, #tpu.memory_space<vmem>>, %arg3: memref<32x128xbf16, #tpu.memory_space<vmem>>, %arg4: memref<1x128xf32, #tpu.memory_space<vmem>>, %arg5: memref<8x32xf32, #tpu.memory_space<vmem>>, %arg6: memref<8x32xf32, #tpu.memory_space<vmem>>, %arg7: memref<32x128xbf16, #tpu.memory_space<vmem>>, %arg8: memref<32x128xbf16, #tpu.memory_space<vmem>>, %arg9: memref<1x128xf32, #tpu.memory_space<vmem>>, %arg10: memref<8x32xf32, #tpu.memory_space<vmem>>, %arg11: memref<8x32xf32, #tpu.memory_space<vmem>>, %arg12: memref<32x128xbf16, #tpu.memory_space<vmem>>, %arg13: memref<1x128xf32, #tpu.memory_space<vmem>>, %arg14: memref<8x128xf32, #tpu.memory_space<vmem>>, %arg15: memref<8x8x128xf32, #tpu.memory_space<vmem>>) attributes {dimension_semantics = [#tpu.dimension_semantics<parallel>], iteration_bounds = array<i64: 1>, scalar_prefetch = 0 : i64, scratch_operands = 1 : i64, tpu.core_type = #tpu.core_type<tc>, window_params = [{transform_indices = @transform_0, window_bounds = array<i64: 8, 8, 4>}, {pipeline_mode = #tpu.pipeline_mode<synchronous>, transform_indices = @transform_1, window_bounds = array<i64: 4, 128>}, {pipeline_mode = #tpu.pipeline_mode<synchronous>, transform_indices = @transform_2, window_bounds = array<i64: 32, 128>}, {pipeline_mode = #tpu.pipeline_mode<synchronous>, transform_indices = @transform_3, window_bounds = array<i64: 1, 128>}, {transform_indices = @transform_4, window_bounds = array<i64: 8, 32>}, {transform_indices = @transform_5, window_bounds = array<i64: 8, 32>}, {pipeline_mode = #tpu.pipeline_mode<synchronous>, transform_indices = @transform_6, window_bounds = array<i64: 32, 128>}, {pipeline_mode = #tpu.pipeline_mode<synchronous>, transform_indices = @transform_7, window_bounds = array<i64: 32, 128>}, {pipeline_mode = #tpu.pipeline_mode<synchronous>, transform_indices = @transform_8, window_bounds = array<i64: 1, 128>}, {transform_indices = @transform_9, window_bounds = array<i64: 8, 32>}, {transform_indices = @transform_10, window_bounds = array<i64: 8, 32>}, {pipeline_mode = #tpu.pipeline_mode<synchronous>, transform_indices = @transform_11, window_bounds = array<i64: 32, 128>}, {pipeline_mode = #tpu.pipeline_mode<synchronous>, transform_indices = @transform_12, window_bounds = array<i64: 1, 128>}, {transform_indices = @transform_13, window_bounds = array<i64: 8, 128>}]} {
    %c0 = arith.constant 0 : index
    %c0_0 = arith.constant 0 : index
    %0 = vector.load %arg2[%c0, %c0_0] : memref<4x128xbf16, #tpu.memory_space<vmem>>, vector<4x128xbf16>
    %c0_1 = arith.constant 0 : index
    %c0_2 = arith.constant 0 : index
    %1 = vector.load %arg3[%c0_1, %c0_2] : memref<32x128xbf16, #tpu.memory_space<vmem>>, vector<32x128xbf16>
    %c0_3 = arith.constant 0 : index
    %c0_4 = arith.constant 0 : index
    %2 = vector.load %arg4[%c0_3, %c0_4] : memref<1x128xf32, #tpu.memory_space<vmem>>, vector<1x128xf32>
    %c0_5 = arith.constant 0 : index
    %c0_6 = arith.constant 0 : index
    %3 = vector.load %arg5[%c0_5, %c0_6] : memref<8x32xf32, #tpu.memory_space<vmem>>, vector<8x32xf32>
    %c0_7 = arith.constant 0 : index
    %c0_8 = arith.constant 0 : index
    %4 = vector.load %arg6[%c0_7, %c0_8] : memref<8x32xf32, #tpu.memory_space<vmem>>, vector<8x32xf32>
    %c0_9 = arith.constant 0 : index
    %c0_10 = arith.constant 0 : index
    %5 = vector.load %arg7[%c0_9, %c0_10] : memref<32x128xbf16, #tpu.memory_space<vmem>>, vector<32x128xbf16>
    %c0_11 = arith.constant 0 : index
    %c0_12 = arith.constant 0 : index
    %6 = vector.load %arg8[%c0_11, %c0_12] : memref<32x128xbf16, #tpu.memory_space<vmem>>, vector<32x128xbf16>
    %c0_13 = arith.constant 0 : index
    %c0_14 = arith.constant 0 : index
    %7 = vector.load %arg9[%c0_13, %c0_14] : memref<1x128xf32, #tpu.memory_space<vmem>>, vector<1x128xf32>
    %8 = vector.shape_cast %7 : vector<1x128xf32> to vector<1x128xf32>
    %9 = vector.broadcast %8 : vector<1x128xf32> to vector<8x128xf32>
    %c0_15 = arith.constant 0 : index
    %c0_16 = arith.constant 0 : index
    %10 = vector.load %arg10[%c0_15, %c0_16] : memref<8x32xf32, #tpu.memory_space<vmem>>, vector<8x32xf32>
    %c0_17 = arith.constant 0 : index
    %c0_18 = arith.constant 0 : index
    %11 = vector.load %arg11[%c0_17, %c0_18] : memref<8x32xf32, #tpu.memory_space<vmem>>, vector<8x32xf32>
    %c0_19 = arith.constant 0 : index
    %c0_20 = arith.constant 0 : index
    %c0_21 = arith.constant 0 : index
    %12 = vector.load %arg1[%c0_19, %c0_20, %c0_21] : memref<8x8x4xf32, #tpu.memory_space<vmem>>, vector<8x8x4xf32>
    %13 = vector.shape_cast %12 : vector<8x8x4xf32> to vector<64x4xf32>
    %14 = arith.truncf %13 : vector<64x4xf32> to vector<64x4xbf16>
    %cst = arith.constant dense<0.000000e+00> : vector<64x128xf32>
    %15 = tpu.matmul %14, %0, %cst {dimension_numbers = #tpu.dot_dimension_numbers<[1], [0], [0], [1], [0, 0, 1, 1], [], []>} : vector<64x4xbf16>, vector<4x128xbf16>, vector<64x128xf32> -> vector<64x128xf32>
    %16 = vector.broadcast %2 : vector<1x128xf32> to vector<64x128xf32>
    %17 = arith.addf %15, %16 : vector<64x128xf32>
    %18 = vector.shape_cast %17 : vector<64x128xf32> to vector<8x8x128xf32>
    %c0_22 = arith.constant 0 : index
    %c0_23 = arith.constant 0 : index
    %c0_24 = arith.constant 0 : index
    %19 = vector.load %arg15[%c0_22, %c0_23, %c0_24] : memref<8x8x128xf32, #tpu.memory_space<vmem>>, vector<8x8x128xf32>
    tpu.vector_store %arg15[%c0_22, %c0_23, %c0_24], %18 {strides = array<i32>} : memref<8x8x128xf32, #tpu.memory_space<vmem>>, vector<8x8x128xf32>,
    %c0_25 = arith.constant 0 : index
    %c0_26 = arith.constant 0 : index
    %c0_27 = arith.constant 0 : index
    %20 = vector.load %arg15[%c0_25, %c0_26, %c0_27] : memref<8x8x128xf32, #tpu.memory_space<vmem>>, vector<1x8x128xf32>
    %21 = vector.shape_cast %20 : vector<1x8x128xf32> to vector<8x128xf32>
    %22 = arith.truncf %3 : vector<8x32xf32> to vector<8x32xbf16>
    %cst_28 = arith.constant dense<0.000000e+00> : vector<8x128xf32>
    %23 = tpu.matmul %22, %1, %cst_28 {dimension_numbers = #tpu.dot_dimension_numbers<[1], [0], [0], [1], [0, 0, 1, 1], [], []>} : vector<8x32xbf16>, vector<32x128xbf16>, vector<8x128xf32> -> vector<8x128xf32>
    %24 = arith.addf %21, %23 : vector<8x128xf32>
    %25 = arith.negf %24 : vector<8x128xf32>
    %26 = math.exp %25 : vector<8x128xf32>
    %cst_29 = arith.constant 1.000000e+00 : f32
    %27 = vector.broadcast %cst_29 : f32 to vector<8x128xf32>
    %28 = arith.addf %27, %26 : vector<8x128xf32>
    %29 = arith.divf %27, %28 : vector<8x128xf32>
    %30 = math.tanh %24 : vector<8x128xf32>
    %31 = vector.extract_strided_slice %29 {offsets = [0, 0], sizes = [8, 32], strides = [1, 1]} : vector<8x128xf32> to vector<8x32xf32>
    %32 = vector.extract_strided_slice %29 {offsets = [0, 32], sizes = [8, 32], strides = [1, 1]} : vector<8x128xf32> to vector<8x32xf32>
    %33 = vector.extract_strided_slice %30 {offsets = [0, 64], sizes = [8, 32], strides = [1, 1]} : vector<8x128xf32> to vector<8x32xf32>
    %34 = vector.extract_strided_slice %29 {offsets = [0, 96], sizes = [8, 32], strides = [1, 1]} : vector<8x128xf32> to vector<8x32xf32>
    %35 = arith.mulf %32, %4 : vector<8x32xf32>
    %36 = arith.mulf %31, %33 : vector<8x32xf32>
    %37 = arith.addf %35, %36 : vector<8x32xf32>
    %38 = math.tanh %37 : vector<8x32xf32>
    %39 = arith.mulf %34, %38 : vector<8x32xf32>
    %c1_i32 = arith.constant 1 : i32
    %40 = arith.index_cast %c1_i32 : i32 to index
    %c0_30 = arith.constant 0 : index
    %c0_31 = arith.constant 0 : index
    %41 = vector.load %arg15[%40, %c0_30, %c0_31] : memref<8x8x128xf32, #tpu.memory_space<vmem>>, vector<1x8x128xf32>
    %42 = vector.shape_cast %41 : vector<1x8x128xf32> to vector<8x128xf32>
    %43 = arith.truncf %39 : vector<8x32xf32> to vector<8x32xbf16>
    %cst_32 = arith.constant dense<0.000000e+00> : vector<8x128xf32>
    %44 = tpu.matmul %43, %1, %cst_32 {dimension_numbers = #tpu.dot_dimension_numbers<[1], [0], [0], [1], [0, 0, 1, 1], [], []>} : vector<8x32xbf16>, vector<32x128xbf16>, vector<8x128xf32> -> vector<8x128xf32>
    %45 = arith.addf %42, %44 : vector<8x128xf32>
    %46 = arith.negf %45 : vector<8x128xf32>
    %47 = math.exp %46 : vector<8x128xf32>
    %cst_33 = arith.constant 1.000000e+00 : f32
    %48 = vector.broadcast %cst_33 : f32 to vector<8x128xf32>
    %49 = arith.addf %48, %47 : vector<8x128xf32>
    %50 = arith.divf %48, %49 : vector<8x128xf32>
    %51 = math.tanh %45 : vector<8x128xf32>
    %52 = vector.extract_strided_slice %50 {offsets = [0, 0], sizes = [8, 32], strides = [1, 1]} : vector<8x128xf32> to vector<8x32xf32>
    %53 = vector.extract_strided_slice %50 {offsets = [0, 32], sizes = [8, 32], strides = [1, 1]} : vector<8x128xf32> to vector<8x32xf32>
    %54 = vector.extract_strided_slice %51 {offsets = [0, 64], sizes = [8, 32], strides = [1, 1]} : vector<8x128xf32> to vector<8x32xf32>
    %55 = vector.extract_strided_slice %50 {offsets = [0, 96], sizes = [8, 32], strides = [1, 1]} : vector<8x128xf32> to vector<8x32xf32>
    %56 = arith.mulf %53, %37 : vector<8x32xf32>
    %57 = arith.mulf %52, %54 : vector<8x32xf32>
    %58 = arith.addf %56, %57 : vector<8x32xf32>
    %59 = math.tanh %58 : vector<8x32xf32>
    %60 = arith.mulf %55, %59 : vector<8x32xf32>
    %61 = arith.truncf %39 : vector<8x32xf32> to vector<8x32xbf16>
    %cst_34 = arith.constant dense<0.000000e+00> : vector<8x128xf32>
    %62 = tpu.matmul %61, %5, %cst_34 {dimension_numbers = #tpu.dot_dimension_numbers<[1], [0], [0], [1], [0, 0, 1, 1], [], []>} : vector<8x32xbf16>, vector<32x128xbf16>, vector<8x128xf32> -> vector<8x128xf32>
    %63 = arith.truncf %10 : vector<8x32xf32> to vector<8x32xbf16>
    %cst_35 = arith.constant dense<0.000000e+00> : vector<8x128xf32>
    %64 = tpu.matmul %63, %6, %cst_35 {dimension_numbers = #tpu.dot_dimension_numbers<[1], [0], [0], [1], [0, 0, 1, 1], [], []>} : vector<8x32xbf16>, vector<32x128xbf16>, vector<8x128xf32> -> vector<8x128xf32>
    %65 = arith.addf %62, %64 : vector<8x128xf32>
    %66 = arith.addf %65, %9 : vector<8x128xf32>
    %67 = arith.negf %66 : vector<8x128xf32>
    %68 = math.exp %67 : vector<8x128xf32>
    %cst_36 = arith.constant 1.000000e+00 : f32
    %69 = vector.broadcast %cst_36 : f32 to vector<8x128xf32>
    %70 = arith.addf %69, %68 : vector<8x128xf32>
    %71 = arith.divf %69, %70 : vector<8x128xf32>
    %72 = math.tanh %66 : vector<8x128xf32>
    %73 = vector.extract_strided_slice %71 {offsets = [0, 0], sizes = [8, 32], strides = [1, 1]} : vector<8x128xf32> to vector<8x32xf32>
    %74 = vector.extract_strided_slice %71 {offsets = [0, 32], sizes = [8, 32], strides = [1, 1]} : vector<8x128xf32> to vector<8x32xf32>
    %75 = vector.extract_strided_slice %72 {offsets = [0, 64], sizes = [8, 32], strides = [1, 1]} : vector<8x128xf32> to vector<8x32xf32>
    %76 = vector.extract_strided_slice %71 {offsets = [0, 96], sizes = [8, 32], strides = [1, 1]} : vector<8x128xf32> to vector<8x32xf32>
    %77 = arith.mulf %74, %11 : vector<8x32xf32>
    %78 = arith.mulf %73, %75 : vector<8x32xf32>
    %79 = arith.addf %77, %78 : vector<8x32xf32>
    %80 = math.tanh %79 : vector<8x32xf32>
    %81 = arith.mulf %76, %80 : vector<8x32xf32>
    %c2_i32 = arith.constant 2 : i32
    %82 = arith.index_cast %c2_i32 : i32 to index
    %c0_37 = arith.constant 0 : index
    %c0_38 = arith.constant 0 : index
    %83 = vector.load %arg15[%82, %c0_37, %c0_38] : memref<8x8x128xf32, #tpu.memory_space<vmem>>, vector<1x8x128xf32>
    %84 = vector.shape_cast %83 : vector<1x8x128xf32> to vector<8x128xf32>
    %85 = arith.truncf %60 : vector<8x32xf32> to vector<8x32xbf16>
    %cst_39 = arith.constant dense<0.000000e+00> : vector<8x128xf32>
    %86 = tpu.matmul %85, %1, %cst_39 {dimension_numbers = #tpu.dot_dimension_numbers<[1], [0], [0], [1], [0, 0, 1, 1], [], []>} : vector<8x32xbf16>, vector<32x128xbf16>, vector<8x128xf32> -> vector<8x128xf32>
    %87 = arith.addf %84, %86 : vector<8x128xf32>
    %88 = arith.negf %87 : vector<8x128xf32>
    %89 = math.exp %88 : vector<8x128xf32>
    %cst_40 = arith.constant 1.000000e+00 : f32
    %90 = vector.broadcast %cst_40 : f32 to vector<8x128xf32>
    %91 = arith.addf %90, %89 : vector<8x128xf32>
    %92 = arith.divf %90, %91 : vector<8x128xf32>
    %93 = math.tanh %87 : vector<8x128xf32>
    %94 = vector.extract_strided_slice %92 {offsets = [0, 0], sizes = [8, 32], strides = [1, 1]} : vector<8x128xf32> to vector<8x32xf32>
    %95 = vector.extract_strided_slice %92 {offsets = [0, 32], sizes = [8, 32], strides = [1, 1]} : vector<8x128xf32> to vector<8x32xf32>
    %96 = vector.extract_strided_slice %93 {offsets = [0, 64], sizes = [8, 32], strides = [1, 1]} : vector<8x128xf32> to vector<8x32xf32>
    %97 = vector.extract_strided_slice %92 {offsets = [0, 96], sizes = [8, 32], strides = [1, 1]} : vector<8x128xf32> to vector<8x32xf32>
    %98 = arith.mulf %95, %58 : vector<8x32xf32>
    %99 = arith.mulf %94, %96 : vector<8x32xf32>
    %100 = arith.addf %98, %99 : vector<8x32xf32>
    %101 = math.tanh %100 : vector<8x32xf32>
    %102 = arith.mulf %97, %101 : vector<8x32xf32>
    %103 = arith.truncf %60 : vector<8x32xf32> to vector<8x32xbf16>
    %cst_41 = arith.constant dense<0.000000e+00> : vector<8x128xf32>
    %104 = tpu.matmul %103, %5, %cst_41 {dimension_numbers = #tpu.dot_dimension_numbers<[1], [0], [0], [1], [0, 0, 1, 1], [], []>} : vector<8x32xbf16>, vector<32x128xbf16>, vector<8x128xf32> -> vector<8x128xf32>
    %105 = arith.truncf %81 : vector<8x32xf32> to vector<8x32xbf16>
    %cst_42 = arith.constant dense<0.000000e+00> : vector<8x128xf32>
    %106 = tpu.matmul %105, %6, %cst_42 {dimension_numbers = #tpu.dot_dimension_numbers<[1], [0], [0], [1], [0, 0, 1, 1], [], []>} : vector<8x32xbf16>, vector<32x128xbf16>, vector<8x128xf32> -> vector<8x128xf32>
    %107 = arith.addf %104, %106 : vector<8x128xf32>
    %108 = arith.addf %107, %9 : vector<8x128xf32>
    %109 = arith.negf %108 : vector<8x128xf32>
    %110 = math.exp %109 : vector<8x128xf32>
    %cst_43 = arith.constant 1.000000e+00 : f32
    %111 = vector.broadcast %cst_43 : f32 to vector<8x128xf32>
    %112 = arith.addf %111, %110 : vector<8x128xf32>
    %113 = arith.divf %111, %112 : vector<8x128xf32>
    %114 = math.tanh %108 : vector<8x128xf32>
    %115 = vector.extract_strided_slice %113 {offsets = [0, 0], sizes = [8, 32], strides = [1, 1]} : vector<8x128xf32> to vector<8x32xf32>
    %116 = vector.extract_strided_slice %113 {offsets = [0, 32], sizes = [8, 32], strides = [1, 1]} : vector<8x128xf32> to vector<8x32xf32>
    %117 = vector.extract_strided_slice %114 {offsets = [0, 64], sizes = [8, 32], strides = [1, 1]} : vector<8x128xf32> to vector<8x32xf32>
    %118 = vector.extract_strided_slice %113 {offsets = [0, 96], sizes = [8, 32], strides = [1, 1]} : vector<8x128xf32> to vector<8x32xf32>
    %119 = arith.mulf %116, %79 : vector<8x32xf32>
    %120 = arith.mulf %115, %117 : vector<8x32xf32>
    %121 = arith.addf %119, %120 : vector<8x32xf32>
    %122 = math.tanh %121 : vector<8x32xf32>
    %123 = arith.mulf %118, %122 : vector<8x32xf32>
    %c3_i32 = arith.constant 3 : i32
    %124 = arith.index_cast %c3_i32 : i32 to index
    %c0_44 = arith.constant 0 : index
    %c0_45 = arith.constant 0 : index
    %125 = vector.load %arg15[%124, %c0_44, %c0_45] : memref<8x8x128xf32, #tpu.memory_space<vmem>>, vector<1x8x128xf32>
    %126 = vector.shape_cast %125 : vector<1x8x128xf32> to vector<8x128xf32>
    %127 = arith.truncf %102 : vector<8x32xf32> to vector<8x32xbf16>
    %cst_46 = arith.constant dense<0.000000e+00> : vector<8x128xf32>
    %128 = tpu.matmul %127, %1, %cst_46 {dimension_numbers = #tpu.dot_dimension_numbers<[1], [0], [0], [1], [0, 0, 1, 1], [], []>} : vector<8x32xbf16>, vector<32x128xbf16>, vector<8x128xf32> -> vector<8x128xf32>
    %129 = arith.addf %126, %128 : vector<8x128xf32>
    %130 = arith.negf %129 : vector<8x128xf32>
    %131 = math.exp %130 : vector<8x128xf32>
    %cst_47 = arith.constant 1.000000e+00 : f32
    %132 = vector.broadcast %cst_47 : f32 to vector<8x128xf32>
    %133 = arith.addf %132, %131 : vector<8x128xf32>
    %134 = arith.divf %132, %133 : vector<8x128xf32>
    %135 = math.tanh %129 : vector<8x128xf32>
    %136 = vector.extract_strided_slice %134 {offsets = [0, 0], sizes = [8, 32], strides = [1, 1]} : vector<8x128xf32> to vector<8x32xf32>
    %137 = vector.extract_strided_slice %134 {offsets = [0, 32], sizes = [8, 32], strides = [1, 1]} : vector<8x128xf32> to vector<8x32xf32>
    %138 = vector.extract_strided_slice %135 {offsets = [0, 64], sizes = [8, 32], strides = [1, 1]} : vector<8x128xf32> to vector<8x32xf32>
    %139 = vector.extract_strided_slice %134 {offsets = [0, 96], sizes = [8, 32], strides = [1, 1]} : vector<8x128xf32> to vector<8x32xf32>
    %140 = arith.mulf %137, %100 : vector<8x32xf32>
    %141 = arith.mulf %136, %138 : vector<8x32xf32>
    %142 = arith.addf %140, %141 : vector<8x32xf32>
    %143 = math.tanh %142 : vector<8x32xf32>
    %144 = arith.mulf %139, %143 : vector<8x32xf32>
    %145 = arith.truncf %102 : vector<8x32xf32> to vector<8x32xbf16>
    %cst_48 = arith.constant dense<0.000000e+00> : vector<8x128xf32>
    %146 = tpu.matmul %145, %5, %cst_48 {dimension_numbers = #tpu.dot_dimension_numbers<[1], [0], [0], [1], [0, 0, 1, 1], [], []>} : vector<8x32xbf16>, vector<32x128xbf16>, vector<8x128xf32> -> vector<8x128xf32>
    %147 = arith.truncf %123 : vector<8x32xf32> to vector<8x32xbf16>
    %cst_49 = arith.constant dense<0.000000e+00> : vector<8x128xf32>
    %148 = tpu.matmul %147, %6, %cst_49 {dimension_numbers = #tpu.dot_dimension_numbers<[1], [0], [0], [1], [0, 0, 1, 1], [], []>} : vector<8x32xbf16>, vector<32x128xbf16>, vector<8x128xf32> -> vector<8x128xf32>
    %149 = arith.addf %146, %148 : vector<8x128xf32>
    %150 = arith.addf %149, %9 : vector<8x128xf32>
    %151 = arith.negf %150 : vector<8x128xf32>
    %152 = math.exp %151 : vector<8x128xf32>
    %cst_50 = arith.constant 1.000000e+00 : f32
    %153 = vector.broadcast %cst_50 : f32 to vector<8x128xf32>
    %154 = arith.addf %153, %152 : vector<8x128xf32>
    %155 = arith.divf %153, %154 : vector<8x128xf32>
    %156 = math.tanh %150 : vector<8x128xf32>
    %157 = vector.extract_strided_slice %155 {offsets = [0, 0], sizes = [8, 32], strides = [1, 1]} : vector<8x128xf32> to vector<8x32xf32>
    %158 = vector.extract_strided_slice %155 {offsets = [0, 32], sizes = [8, 32], strides = [1, 1]} : vector<8x128xf32> to vector<8x32xf32>
    %159 = vector.extract_strided_slice %156 {offsets = [0, 64], sizes = [8, 32], strides = [1, 1]} : vector<8x128xf32> to vector<8x32xf32>
    %160 = vector.extract_strided_slice %155 {offsets = [0, 96], sizes = [8, 32], strides = [1, 1]} : vector<8x128xf32> to vector<8x32xf32>
    %161 = arith.mulf %158, %121 : vector<8x32xf32>
    %162 = arith.mulf %157, %159 : vector<8x32xf32>
    %163 = arith.addf %161, %162 : vector<8x32xf32>
    %164 = math.tanh %163 : vector<8x32xf32>
    %165 = arith.mulf %160, %164 : vector<8x32xf32>
    %c4_i32 = arith.constant 4 : i32
    %166 = arith.index_cast %c4_i32 : i32 to index
    %c0_51 = arith.constant 0 : index
    %c0_52 = arith.constant 0 : index
    %167 = vector.load %arg15[%166, %c0_51, %c0_52] : memref<8x8x128xf32, #tpu.memory_space<vmem>>, vector<1x8x128xf32>
    %168 = vector.shape_cast %167 : vector<1x8x128xf32> to vector<8x128xf32>
    %169 = arith.truncf %144 : vector<8x32xf32> to vector<8x32xbf16>
    %cst_53 = arith.constant dense<0.000000e+00> : vector<8x128xf32>
    %170 = tpu.matmul %169, %1, %cst_53 {dimension_numbers = #tpu.dot_dimension_numbers<[1], [0], [0], [1], [0, 0, 1, 1], [], []>} : vector<8x32xbf16>, vector<32x128xbf16>, vector<8x128xf32> -> vector<8x128xf32>
    %171 = arith.addf %168, %170 : vector<8x128xf32>
    %172 = arith.negf %171 : vector<8x128xf32>
    %173 = math.exp %172 : vector<8x128xf32>
    %cst_54 = arith.constant 1.000000e+00 : f32
    %174 = vector.broadcast %cst_54 : f32 to vector<8x128xf32>
    %175 = arith.addf %174, %173 : vector<8x128xf32>
    %176 = arith.divf %174, %175 : vector<8x128xf32>
    %177 = math.tanh %171 : vector<8x128xf32>
    %178 = vector.extract_strided_slice %176 {offsets = [0, 0], sizes = [8, 32], strides = [1, 1]} : vector<8x128xf32> to vector<8x32xf32>
    %179 = vector.extract_strided_slice %176 {offsets = [0, 32], sizes = [8, 32], strides = [1, 1]} : vector<8x128xf32> to vector<8x32xf32>
    %180 = vector.extract_strided_slice %177 {offsets = [0, 64], sizes = [8, 32], strides = [1, 1]} : vector<8x128xf32> to vector<8x32xf32>
    %181 = vector.extract_strided_slice %176 {offsets = [0, 96], sizes = [8, 32], strides = [1, 1]} : vector<8x128xf32> to vector<8x32xf32>
    %182 = arith.mulf %179, %142 : vector<8x32xf32>
    %183 = arith.mulf %178, %180 : vector<8x32xf32>
    %184 = arith.addf %182, %183 : vector<8x32xf32>
    %185 = math.tanh %184 : vector<8x32xf32>
    %186 = arith.mulf %181, %185 : vector<8x32xf32>
    %187 = arith.truncf %144 : vector<8x32xf32> to vector<8x32xbf16>
    %cst_55 = arith.constant dense<0.000000e+00> : vector<8x128xf32>
    %188 = tpu.matmul %187, %5, %cst_55 {dimension_numbers = #tpu.dot_dimension_numbers<[1], [0], [0], [1], [0, 0, 1, 1], [], []>} : vector<8x32xbf16>, vector<32x128xbf16>, vector<8x128xf32> -> vector<8x128xf32>
    %189 = arith.truncf %165 : vector<8x32xf32> to vector<8x32xbf16>
    %cst_56 = arith.constant dense<0.000000e+00> : vector<8x128xf32>
    %190 = tpu.matmul %189, %6, %cst_56 {dimension_numbers = #tpu.dot_dimension_numbers<[1], [0], [0], [1], [0, 0, 1, 1], [], []>} : vector<8x32xbf16>, vector<32x128xbf16>, vector<8x128xf32> -> vector<8x128xf32>
    %191 = arith.addf %188, %190 : vector<8x128xf32>
    %192 = arith.addf %191, %9 : vector<8x128xf32>
    %193 = arith.negf %192 : vector<8x128xf32>
    %194 = math.exp %193 : vector<8x128xf32>
    %cst_57 = arith.constant 1.000000e+00 : f32
    %195 = vector.broadcast %cst_57 : f32 to vector<8x128xf32>
    %196 = arith.addf %195, %194 : vector<8x128xf32>
    %197 = arith.divf %195, %196 : vector<8x128xf32>
    %198 = math.tanh %192 : vector<8x128xf32>
    %199 = vector.extract_strided_slice %197 {offsets = [0, 0], sizes = [8, 32], strides = [1, 1]} : vector<8x128xf32> to vector<8x32xf32>
    %200 = vector.extract_strided_slice %197 {offsets = [0, 32], sizes = [8, 32], strides = [1, 1]} : vector<8x128xf32> to vector<8x32xf32>
    %201 = vector.extract_strided_slice %198 {offsets = [0, 64], sizes = [8, 32], strides = [1, 1]} : vector<8x128xf32> to vector<8x32xf32>
    %202 = vector.extract_strided_slice %197 {offsets = [0, 96], sizes = [8, 32], strides = [1, 1]} : vector<8x128xf32> to vector<8x32xf32>
    %203 = arith.mulf %200, %163 : vector<8x32xf32>
    %204 = arith.mulf %199, %201 : vector<8x32xf32>
    %205 = arith.addf %203, %204 : vector<8x32xf32>
    %206 = math.tanh %205 : vector<8x32xf32>
    %207 = arith.mulf %202, %206 : vector<8x32xf32>
    %c5_i32 = arith.constant 5 : i32
    %208 = arith.index_cast %c5_i32 : i32 to index
    %c0_58 = arith.constant 0 : index
    %c0_59 = arith.constant 0 : index
    %209 = vector.load %arg15[%208, %c0_58, %c0_59] : memref<8x8x128xf32, #tpu.memory_space<vmem>>, vector<1x8x128xf32>
    %210 = vector.shape_cast %209 : vector<1x8x128xf32> to vector<8x128xf32>
    %211 = arith.truncf %186 : vector<8x32xf32> to vector<8x32xbf16>
    %cst_60 = arith.constant dense<0.000000e+00> : vector<8x128xf32>
    %212 = tpu.matmul %211, %1, %cst_60 {dimension_numbers = #tpu.dot_dimension_numbers<[1], [0], [0], [1], [0, 0, 1, 1], [], []>} : vector<8x32xbf16>, vector<32x128xbf16>, vector<8x128xf32> -> vector<8x128xf32>
    %213 = arith.addf %210, %212 : vector<8x128xf32>
    %214 = arith.negf %213 : vector<8x128xf32>
    %215 = math.exp %214 : vector<8x128xf32>
    %cst_61 = arith.constant 1.000000e+00 : f32
    %216 = vector.broadcast %cst_61 : f32 to vector<8x128xf32>
    %217 = arith.addf %216, %215 : vector<8x128xf32>
    %218 = arith.divf %216, %217 : vector<8x128xf32>
    %219 = math.tanh %213 : vector<8x128xf32>
    %220 = vector.extract_strided_slice %218 {offsets = [0, 0], sizes = [8, 32], strides = [1, 1]} : vector<8x128xf32> to vector<8x32xf32>
    %221 = vector.extract_strided_slice %218 {offsets = [0, 32], sizes = [8, 32], strides = [1, 1]} : vector<8x128xf32> to vector<8x32xf32>
    %222 = vector.extract_strided_slice %219 {offsets = [0, 64], sizes = [8, 32], strides = [1, 1]} : vector<8x128xf32> to vector<8x32xf32>
    %223 = vector.extract_strided_slice %218 {offsets = [0, 96], sizes = [8, 32], strides = [1, 1]} : vector<8x128xf32> to vector<8x32xf32>
    %224 = arith.mulf %221, %184 : vector<8x32xf32>
    %225 = arith.mulf %220, %222 : vector<8x32xf32>
    %226 = arith.addf %224, %225 : vector<8x32xf32>
    %227 = math.tanh %226 : vector<8x32xf32>
    %228 = arith.mulf %223, %227 : vector<8x32xf32>
    %229 = arith.truncf %186 : vector<8x32xf32> to vector<8x32xbf16>
    %cst_62 = arith.constant dense<0.000000e+00> : vector<8x128xf32>
    %230 = tpu.matmul %229, %5, %cst_62 {dimension_numbers = #tpu.dot_dimension_numbers<[1], [0], [0], [1], [0, 0, 1, 1], [], []>} : vector<8x32xbf16>, vector<32x128xbf16>, vector<8x128xf32> -> vector<8x128xf32>
    %231 = arith.truncf %207 : vector<8x32xf32> to vector<8x32xbf16>
    %cst_63 = arith.constant dense<0.000000e+00> : vector<8x128xf32>
    %232 = tpu.matmul %231, %6, %cst_63 {dimension_numbers = #tpu.dot_dimension_numbers<[1], [0], [0], [1], [0, 0, 1, 1], [], []>} : vector<8x32xbf16>, vector<32x128xbf16>, vector<8x128xf32> -> vector<8x128xf32>
    %233 = arith.addf %230, %232 : vector<8x128xf32>
    %234 = arith.addf %233, %9 : vector<8x128xf32>
    %235 = arith.negf %234 : vector<8x128xf32>
    %236 = math.exp %235 : vector<8x128xf32>
    %cst_64 = arith.constant 1.000000e+00 : f32
    %237 = vector.broadcast %cst_64 : f32 to vector<8x128xf32>
    %238 = arith.addf %237, %236 : vector<8x128xf32>
    %239 = arith.divf %237, %238 : vector<8x128xf32>
    %240 = math.tanh %234 : vector<8x128xf32>
    %241 = vector.extract_strided_slice %239 {offsets = [0, 0], sizes = [8, 32], strides = [1, 1]} : vector<8x128xf32> to vector<8x32xf32>
    %242 = vector.extract_strided_slice %239 {offsets = [0, 32], sizes = [8, 32], strides = [1, 1]} : vector<8x128xf32> to vector<8x32xf32>
    %243 = vector.extract_strided_slice %240 {offsets = [0, 64], sizes = [8, 32], strides = [1, 1]} : vector<8x128xf32> to vector<8x32xf32>
    %244 = vector.extract_strided_slice %239 {offsets = [0, 96], sizes = [8, 32], strides = [1, 1]} : vector<8x128xf32> to vector<8x32xf32>
    %245 = arith.mulf %242, %205 : vector<8x32xf32>
    %246 = arith.mulf %241, %243 : vector<8x32xf32>
    %247 = arith.addf %245, %246 : vector<8x32xf32>
    %248 = math.tanh %247 : vector<8x32xf32>
    %249 = arith.mulf %244, %248 : vector<8x32xf32>
    %c6_i32 = arith.constant 6 : i32
    %250 = arith.index_cast %c6_i32 : i32 to index
    %c0_65 = arith.constant 0 : index
    %c0_66 = arith.constant 0 : index
    %251 = vector.load %arg15[%250, %c0_65, %c0_66] : memref<8x8x128xf32, #tpu.memory_space<vmem>>, vector<1x8x128xf32>
    %252 = vector.shape_cast %251 : vector<1x8x128xf32> to vector<8x128xf32>
    %253 = arith.truncf %228 : vector<8x32xf32> to vector<8x32xbf16>
    %cst_67 = arith.constant dense<0.000000e+00> : vector<8x128xf32>
    %254 = tpu.matmul %253, %1, %cst_67 {dimension_numbers = #tpu.dot_dimension_numbers<[1], [0], [0], [1], [0, 0, 1, 1], [], []>} : vector<8x32xbf16>, vector<32x128xbf16>, vector<8x128xf32> -> vector<8x128xf32>
    %255 = arith.addf %252, %254 : vector<8x128xf32>
    %256 = arith.negf %255 : vector<8x128xf32>
    %257 = math.exp %256 : vector<8x128xf32>
    %cst_68 = arith.constant 1.000000e+00 : f32
    %258 = vector.broadcast %cst_68 : f32 to vector<8x128xf32>
    %259 = arith.addf %258, %257 : vector<8x128xf32>
    %260 = arith.divf %258, %259 : vector<8x128xf32>
    %261 = math.tanh %255 : vector<8x128xf32>
    %262 = vector.extract_strided_slice %260 {offsets = [0, 0], sizes = [8, 32], strides = [1, 1]} : vector<8x128xf32> to vector<8x32xf32>
    %263 = vector.extract_strided_slice %260 {offsets = [0, 32], sizes = [8, 32], strides = [1, 1]} : vector<8x128xf32> to vector<8x32xf32>
    %264 = vector.extract_strided_slice %261 {offsets = [0, 64], sizes = [8, 32], strides = [1, 1]} : vector<8x128xf32> to vector<8x32xf32>
    %265 = vector.extract_strided_slice %260 {offsets = [0, 96], sizes = [8, 32], strides = [1, 1]} : vector<8x128xf32> to vector<8x32xf32>
    %266 = arith.mulf %263, %226 : vector<8x32xf32>
    %267 = arith.mulf %262, %264 : vector<8x32xf32>
    %268 = arith.addf %266, %267 : vector<8x32xf32>
    %269 = math.tanh %268 : vector<8x32xf32>
    %270 = arith.mulf %265, %269 : vector<8x32xf32>
    %271 = arith.truncf %228 : vector<8x32xf32> to vector<8x32xbf16>
    %cst_69 = arith.constant dense<0.000000e+00> : vector<8x128xf32>
    %272 = tpu.matmul %271, %5, %cst_69 {dimension_numbers = #tpu.dot_dimension_numbers<[1], [0], [0], [1], [0, 0, 1, 1], [], []>} : vector<8x32xbf16>, vector<32x128xbf16>, vector<8x128xf32> -> vector<8x128xf32>
    %273 = arith.truncf %249 : vector<8x32xf32> to vector<8x32xbf16>
    %cst_70 = arith.constant dense<0.000000e+00> : vector<8x128xf32>
    %274 = tpu.matmul %273, %6, %cst_70 {dimension_numbers = #tpu.dot_dimension_numbers<[1], [0], [0], [1], [0, 0, 1, 1], [], []>} : vector<8x32xbf16>, vector<32x128xbf16>, vector<8x128xf32> -> vector<8x128xf32>
    %275 = arith.addf %272, %274 : vector<8x128xf32>
    %276 = arith.addf %275, %9 : vector<8x128xf32>
    %277 = arith.negf %276 : vector<8x128xf32>
    %278 = math.exp %277 : vector<8x128xf32>
    %cst_71 = arith.constant 1.000000e+00 : f32
    %279 = vector.broadcast %cst_71 : f32 to vector<8x128xf32>
    %280 = arith.addf %279, %278 : vector<8x128xf32>
    %281 = arith.divf %279, %280 : vector<8x128xf32>
    %282 = math.tanh %276 : vector<8x128xf32>
    %283 = vector.extract_strided_slice %281 {offsets = [0, 0], sizes = [8, 32], strides = [1, 1]} : vector<8x128xf32> to vector<8x32xf32>
    %284 = vector.extract_strided_slice %281 {offsets = [0, 32], sizes = [8, 32], strides = [1, 1]} : vector<8x128xf32> to vector<8x32xf32>
    %285 = vector.extract_strided_slice %282 {offsets = [0, 64], sizes = [8, 32], strides = [1, 1]} : vector<8x128xf32> to vector<8x32xf32>
    %286 = vector.extract_strided_slice %281 {offsets = [0, 96], sizes = [8, 32], strides = [1, 1]} : vector<8x128xf32> to vector<8x32xf32>
    %287 = arith.mulf %284, %247 : vector<8x32xf32>
    %288 = arith.mulf %283, %285 : vector<8x32xf32>
    %289 = arith.addf %287, %288 : vector<8x32xf32>
    %290 = math.tanh %289 : vector<8x32xf32>
    %291 = arith.mulf %286, %290 : vector<8x32xf32>
    %c7_i32 = arith.constant 7 : i32
    %292 = arith.index_cast %c7_i32 : i32 to index
    %c0_72 = arith.constant 0 : index
    %c0_73 = arith.constant 0 : index
    %293 = vector.load %arg15[%292, %c0_72, %c0_73] : memref<8x8x128xf32, #tpu.memory_space<vmem>>, vector<1x8x128xf32>
    %294 = vector.shape_cast %293 : vector<1x8x128xf32> to vector<8x128xf32>
    %295 = arith.truncf %270 : vector<8x32xf32> to vector<8x32xbf16>
    %cst_74 = arith.constant dense<0.000000e+00> : vector<8x128xf32>
    %296 = tpu.matmul %295, %1, %cst_74 {dimension_numbers = #tpu.dot_dimension_numbers<[1], [0], [0], [1], [0, 0, 1, 1], [], []>} : vector<8x32xbf16>, vector<32x128xbf16>, vector<8x128xf32> -> vector<8x128xf32>
    %297 = arith.addf %294, %296 : vector<8x128xf32>
    %298 = arith.negf %297 : vector<8x128xf32>
    %299 = math.exp %298 : vector<8x128xf32>
    %cst_75 = arith.constant 1.000000e+00 : f32
    %300 = vector.broadcast %cst_75 : f32 to vector<8x128xf32>
    %301 = arith.addf %300, %299 : vector<8x128xf32>
    %302 = arith.divf %300, %301 : vector<8x128xf32>
    %303 = math.tanh %297 : vector<8x128xf32>
    %304 = vector.extract_strided_slice %302 {offsets = [0, 0], sizes = [8, 32], strides = [1, 1]} : vector<8x128xf32> to vector<8x32xf32>
    %305 = vector.extract_strided_slice %302 {offsets = [0, 32], sizes = [8, 32], strides = [1, 1]} : vector<8x128xf32> to vector<8x32xf32>
    %306 = vector.extract_strided_slice %303 {offsets = [0, 64], sizes = [8, 32], strides = [1, 1]} : vector<8x128xf32> to vector<8x32xf32>
    %307 = vector.extract_strided_slice %302 {offsets = [0, 96], sizes = [8, 32], strides = [1, 1]} : vector<8x128xf32> to vector<8x32xf32>
    %308 = arith.mulf %305, %268 : vector<8x32xf32>
    %309 = arith.mulf %304, %306 : vector<8x32xf32>
    %310 = arith.addf %308, %309 : vector<8x32xf32>
    %311 = math.tanh %310 : vector<8x32xf32>
    %312 = arith.mulf %307, %311 : vector<8x32xf32>
    %313 = arith.truncf %270 : vector<8x32xf32> to vector<8x32xbf16>
    %cst_76 = arith.constant dense<0.000000e+00> : vector<8x128xf32>
    %314 = tpu.matmul %313, %5, %cst_76 {dimension_numbers = #tpu.dot_dimension_numbers<[1], [0], [0], [1], [0, 0, 1, 1], [], []>} : vector<8x32xbf16>, vector<32x128xbf16>, vector<8x128xf32> -> vector<8x128xf32>
    %315 = arith.truncf %291 : vector<8x32xf32> to vector<8x32xbf16>
    %cst_77 = arith.constant dense<0.000000e+00> : vector<8x128xf32>
    %316 = tpu.matmul %315, %6, %cst_77 {dimension_numbers = #tpu.dot_dimension_numbers<[1], [0], [0], [1], [0, 0, 1, 1], [], []>} : vector<8x32xbf16>, vector<32x128xbf16>, vector<8x128xf32> -> vector<8x128xf32>
    %317 = arith.addf %314, %316 : vector<8x128xf32>
    %318 = arith.addf %317, %9 : vector<8x128xf32>
    %319 = arith.negf %318 : vector<8x128xf32>
    %320 = math.exp %319 : vector<8x128xf32>
    %cst_78 = arith.constant 1.000000e+00 : f32
    %321 = vector.broadcast %cst_78 : f32 to vector<8x128xf32>
    %322 = arith.addf %321, %320 : vector<8x128xf32>
    %323 = arith.divf %321, %322 : vector<8x128xf32>
    %324 = math.tanh %318 : vector<8x128xf32>
    %325 = vector.extract_strided_slice %323 {offsets = [0, 0], sizes = [8, 32], strides = [1, 1]} : vector<8x128xf32> to vector<8x32xf32>
    %326 = vector.extract_strided_slice %323 {offsets = [0, 32], sizes = [8, 32], strides = [1, 1]} : vector<8x128xf32> to vector<8x32xf32>
    %327 = vector.extract_strided_slice %324 {offsets = [0, 64], sizes = [8, 32], strides = [1, 1]} : vector<8x128xf32> to vector<8x32xf32>
    %328 = vector.extract_strided_slice %323 {offsets = [0, 96], sizes = [8, 32], strides = [1, 1]} : vector<8x128xf32> to vector<8x32xf32>
    %329 = arith.mulf %326, %289 : vector<8x32xf32>
    %330 = arith.mulf %325, %327 : vector<8x32xf32>
    %331 = arith.addf %329, %330 : vector<8x32xf32>
    %332 = math.tanh %331 : vector<8x32xf32>
    %333 = arith.mulf %328, %332 : vector<8x32xf32>
    %c7_i32_79 = arith.constant 7 : i32
    %334 = arith.truncf %312 : vector<8x32xf32> to vector<8x32xbf16>
    %cst_80 = arith.constant dense<0.000000e+00> : vector<8x128xf32>
    %335 = tpu.matmul %334, %5, %cst_80 {dimension_numbers = #tpu.dot_dimension_numbers<[1], [0], [0], [1], [0, 0, 1, 1], [], []>} : vector<8x32xbf16>, vector<32x128xbf16>, vector<8x128xf32> -> vector<8x128xf32>
    %336 = arith.truncf %333 : vector<8x32xf32> to vector<8x32xbf16>
    %cst_81 = arith.constant dense<0.000000e+00> : vector<8x128xf32>
    %337 = tpu.matmul %336, %6, %cst_81 {dimension_numbers = #tpu.dot_dimension_numbers<[1], [0], [0], [1], [0, 0, 1, 1], [], []>} : vector<8x32xbf16>, vector<32x128xbf16>, vector<8x128xf32> -> vector<8x128xf32>
    %338 = arith.addf %335, %337 : vector<8x128xf32>
    %339 = arith.addf %338, %9 : vector<8x128xf32>
    %340 = arith.negf %339 : vector<8x128xf32>
    %341 = math.exp %340 : vector<8x128xf32>
    %cst_82 = arith.constant 1.000000e+00 : f32
    %342 = vector.broadcast %cst_82 : f32 to vector<8x128xf32>
    %343 = arith.addf %342, %341 : vector<8x128xf32>
    %344 = arith.divf %342, %343 : vector<8x128xf32>
    %345 = math.tanh %339 : vector<8x128xf32>
    %346 = vector.extract_strided_slice %344 {offsets = [0, 0], sizes = [8, 32], strides = [1, 1]} : vector<8x128xf32> to vector<8x32xf32>
    %347 = vector.extract_strided_slice %344 {offsets = [0, 32], sizes = [8, 32], strides = [1, 1]} : vector<8x128xf32> to vector<8x32xf32>
    %348 = vector.extract_strided_slice %345 {offsets = [0, 64], sizes = [8, 32], strides = [1, 1]} : vector<8x128xf32> to vector<8x32xf32>
    %349 = vector.extract_strided_slice %344 {offsets = [0, 96], sizes = [8, 32], strides = [1, 1]} : vector<8x128xf32> to vector<8x32xf32>
    %350 = arith.mulf %347, %331 : vector<8x32xf32>
    %351 = arith.mulf %346, %348 : vector<8x32xf32>
    %352 = arith.addf %350, %351 : vector<8x32xf32>
    %353 = math.tanh %352 : vector<8x32xf32>
    %354 = arith.mulf %349, %353 : vector<8x32xf32>
    %355 = arith.truncf %354 : vector<8x32xf32> to vector<8x32xbf16>
    %c0_83 = arith.constant 0 : index
    %c0_84 = arith.constant 0 : index
    %356 = vector.load %arg12[%c0_83, %c0_84] : memref<32x128xbf16, #tpu.memory_space<vmem>>, vector<32x128xbf16>
    %cst_85 = arith.constant dense<0.000000e+00> : vector<8x128xf32>
    %357 = tpu.matmul %355, %356, %cst_85 {dimension_numbers = #tpu.dot_dimension_numbers<[1], [0], [0], [1], [0, 0, 1, 1], [], []>} : vector<8x32xbf16>, vector<32x128xbf16>, vector<8x128xf32> -> vector<8x128xf32>
    %c0_86 = arith.constant 0 : index
    %c0_87 = arith.constant 0 : index
    %358 = vector.load %arg13[%c0_86, %c0_87] : memref<1x128xf32, #tpu.memory_space<vmem>>, vector<1x128xf32>
    %359 = vector.broadcast %358 : vector<1x128xf32> to vector<8x128xf32>
    %360 = arith.addf %357, %359 : vector<8x128xf32>
    %c0_88 = arith.constant 0 : index
    %c0_89 = arith.constant 0 : index
    %361 = vector.load %arg14[%c0_88, %c0_89] : memref<8x128xf32, #tpu.memory_space<vmem>>, vector<8x128xf32>
    tpu.vector_store %arg14[%c0_88, %c0_89], %360 {strides = array<i32>} : memref<8x128xf32, #tpu.memory_space<vmem>>, vector<8x128xf32>,
    return
  }
  func.func @transform_0(%arg0: i32) -> (i32, i32, i32) {
    %c0_i32 = arith.constant 0 : i32
    %c0_i32_0 = arith.constant 0 : i32
    %c0_i32_1 = arith.constant 0 : i32
    return %c0_i32, %arg0, %c0_i32_0 : i32, i32, i32
  }
  func.func @transform_1(%arg0: i32) -> (i32, i32) {
    %c0_i32 = arith.constant 0 : i32
    %c0_i32_0 = arith.constant 0 : i32
    %c0_i32_1 = arith.constant 0 : i32
    return %c0_i32, %c0_i32_0 : i32, i32
  }
  func.func @transform_2(%arg0: i32) -> (i32, i32) {
    %c0_i32 = arith.constant 0 : i32
    %c0_i32_0 = arith.constant 0 : i32
    %c0_i32_1 = arith.constant 0 : i32
    return %c0_i32, %c0_i32_0 : i32, i32
  }
  func.func @transform_3(%arg0: i32) -> (i32, i32) {
    %c0_i32 = arith.constant 0 : i32
    %c0_i32_0 = arith.constant 0 : i32
    %c0_i32_1 = arith.constant 0 : i32
    return %c0_i32, %c0_i32_0 : i32, i32
  }
  func.func @transform_4(%arg0: i32) -> (i32, i32) {
    %c0_i32 = arith.constant 0 : i32
    %c0_i32_0 = arith.constant 0 : i32
    return %arg0, %c0_i32 : i32, i32
  }
  func.func @transform_5(%arg0: i32) -> (i32, i32) {
    %c0_i32 = arith.constant 0 : i32
    %c0_i32_0 = arith.constant 0 : i32
    return %arg0, %c0_i32 : i32, i32
  }
  func.func @transform_6(%arg0: i32) -> (i32, i32) {
    %c0_i32 = arith.constant 0 : i32
    %c0_i32_0 = arith.constant 0 : i32
    %c0_i32_1 = arith.constant 0 : i32
    return %c0_i32, %c0_i32_0 : i32, i32
  }
  func.func @transform_7(%arg0: i32) -> (i32, i32) {
    %c0_i32 = arith.constant 0 : i32
    %c0_i32_0 = arith.constant 0 : i32
    %c0_i32_1 = arith.constant 0 : i32
    return %c0_i32, %c0_i32_0 : i32, i32
  }
  func.func @transform_8(%arg0: i32) -> (i32, i32) {
    %c0_i32 = arith.constant 0 : i32
    %c0_i32_0 = arith.constant 0 : i32
    %c0_i32_1 = arith.constant 0 : i32
    return %c0_i32, %c0_i32_0 : i32, i32
  }
  func.func @transform_9(%arg0: i32) -> (i32, i32) {
    %c0_i32 = arith.constant 0 : i32
    %c0_i32_0 = arith.constant 0 : i32
    return %arg0, %c0_i32 : i32, i32
  }
  func.func @transform_10(%arg0: i32) -> (i32, i32) {
    %c0_i32 = arith.constant 0 : i32
    %c0_i32_0 = arith.constant 0 : i32
    return %arg0, %c0_i32 : i32, i32
  }
  func.func @transform_11(%arg0: i32) -> (i32, i32) {
    %c0_i32 = arith.constant 0 : i32
    %c0_i32_0 = arith.constant 0 : i32
    %c0_i32_1 = arith.constant 0 : i32
    return %c0_i32, %c0_i32_0 : i32, i32
  }
  func.func @transform_12(%arg0: i32) -> (i32, i32) {
    %c0_i32 = arith.constant 0 : i32
    %c0_i32_0 = arith.constant 0 : i32
    %c0_i32_1 = arith.constant 0 : i32
    return %c0_i32, %c0_i32_0 : i32, i32
  }
  func.func @transform_13(%arg0: i32) -> (i32, i32) {
    %c0_i32 = arith.constant 0 : i32
    %c0_i32_0 = arith.constant 0 : i32
    return %arg0, %c0_i32 : i32, i32
  }
}

</mosaic_0001>

<bundles_post_ra>
// kernel: lstm_forward.1
= control target key start
LH: loop header
LB: loop body
LE: loop exit
PB: predicated region body
PF: predicated region fallthrough
CT: control target
= control target key end

     0   :  { %vm101_vm0 = vcmask 1041408   ;;  %v2279_v1 = vmov 0.0   ;;  %vm2280_vm1 = vmmov 0   ;;  %vm88_vm2 = vcmask 31744   ;;  %s2281_s24 = smov 64   ;;  %s2282_s27 = smov 32   ;;  %s2785_s1 = inlined_call_operand.vmem [shape: bf16[4,128], index: 1, kind: input, shape index: {}]   ;;  %s2786_s2 = inlined_call_operand.vmem [shape: bf16[32,128], index: 2, kind: input, shape index: {}]   ;;  %s2787_s0 = inlined_call_operand.vmem [shape: f32[8,8,4], index: 0, kind: input, shape index: {}]   ;;  %s2788_s4 = inlined_call_operand.vmem [shape: f32[8,32], index: 4, kind: input, shape index: {}]   ;;  %s2789_s3 = inlined_call_operand.vmem [shape: f32[1,128], index: 3, kind: input, shape index: {}]   ;;  %s2790_s5 = inlined_call_operand.vmem [shape: f32[8,32], index: 5, kind: input, shape index: {}]   ;;  %s2791_s7 = inlined_call_operand.vmem [shape: bf16[32,128], index: 7, kind: input, shape index: {}]   ;;  %s2792_s6 = inlined_call_operand.vmem [shape: bf16[32,128], index: 6, kind: input, shape index: {}]   ;;  %s2793_s9 = inlined_call_operand.vmem [shape: f32[8,32], index: 9, kind: input, shape index: {}]   ;;  %s2794_s8 = inlined_call_operand.vmem [shape: f32[1,128], index: 8, kind: input, shape index: {}]   ;;  %s2795_s10 = inlined_call_operand.vmem [shape: f32[8,32], index: 10, kind: input, shape index: {}]   ;;  %s2796_s11 = inlined_call_operand.vmem [shape: bf16[32,128], index: 11, kind: input, shape index: {}]   ;;  %s2797_s12 = inlined_call_operand.vmem [shape: f32[1,128], index: 12, kind: input, shape index: {}]   ;;  %s2798_s13 = inlined_call_operand.vmem [shape: f32[8,128], index: 13, kind: output, shape index: {}]  }
   0x1   :  { %v45_v0 = vld [vmem:[%s2785_s1] sm:$0x3]  ;;  %1932 = vmatprep.subr.bf16.mxu1 %v2279_v1  ;;  %1936 = vmatprep.mubr.msk.bf16.mxu1 %vm2280_vm1, %v2279_v1  ;;  %v2362_v3 = vld [vmem:[%s2786_s2 + $0x8] sm:$0xff]   ;;  %v72_v7 = vld [vmem:[%s2787_s0 + $0x10] sm:$0xff]  ;;  %vm192_vm3 = vcmask 261120  }
   0x2   :  { %2132 = vmatprep.subr.msk.bf16.mxu0 %vm101_vm0, %v45_v0  ;;  %v103_v2 = vsel %vm101_vm0, %v45_v0, 0  ;;  %v70_v4 = vld [vmem:[%s2787_s0] sm:$0xff]  ;;  %v71_v5 = vld [vmem:[%s2787_s0 + $0x8] sm:$0xff]  ;;  %v73_v8 = vld [vmem:[%s2787_s0 + $0x18] sm:$0xff]  ;;  %1933 = vmatpush3.bf16.msra.mxu1 %v2362_v3 }
   0x3   :  { %1923 = vmatpush3.bf16.msra.mxu0 %v103_v2  ;;  %v78_v6 = vpack.c.bf16 %v71_v5, %v70_v4  ;;  %v79_v9 = vpack.c.bf16 %v73_v8, %v72_v7  ;;  %v2380_v10 = vld [vmem:[%s2786_s2] sm:$0xff]   ;;  %1934 = vmatprep.subr.bf16.mxu1 %v2279_v1  ;;  %v75_v35 = vld [vmem:[%s2787_s0 + $0x28] sm:$0xff]  ;;  %v76_v36 = vld [vmem:[%s2787_s0 + $0x30] sm:$0xff] }
   0x4   :  { %v51_v11 = vld [vmem:[%s2788_s4] sm:$0xff]  ;;  %1948 = vmatprep.subr.bf16.mxu0 %v2279_v1  ;;  %v2427_v37 = vld [vmem:[%s2791_s7 + $0x8] sm:$0xff]   ;;  %v77_v39 = vld [vmem:[%s2787_s0 + $0x38] sm:$0xff] }
   0x5   :  { %1924 = vmatprep.mubr.msk.bf16.mxu0 %vm88_vm2, %v78_v6  ;;  %v179_v12 = vpack.c.bf16 %v51_v11, %v51_v11  ;;  %v2403_v14 = vld [vmem:[%s2789_s3] ss:$0 sm:$0xff]  ;;  %v81_v40 = vpack.c.bf16 %v77_v39, %v76_v36  ;;  %v2460_v48 = vld [vmem:[%s2792_s6 + $0x8] sm:$0xff]  }
   0x6   :  { %1925 = vmatmul.mubr.msk.bf16.vlgmr.msra.gmra.mxu0 %vm88_vm2, %v79_v9  ;;  %1935 = vmatpush3.bf16.msra.mxu1 %v2380_v10  ;;  %v52_v23 = vld [vmem:[%s2790_s5] sm:$0xff] }
   0x7   :  { %1940 = vmatprep.subr.bf16.mxu1 %v2279_v1  ;;  %v74_v34 = vld [vmem:[%s2787_s0 + $0x20] sm:$0xff]  ;;  %1949 = vmatpush3.bf16.msra.mxu0 %v2427_v37 }
   0x8   :  { %v80_v38 = vpack.c.bf16 %v75_v35, %v74_v34  ;;  %v2437_v41 = vld [vmem:[%s2791_s7] sm:$0xff]   ;;  %1950 = vmatprep.subr.bf16.mxu0 %v2279_v1 }
   0x9   :  { %1937 = vmatmul.mubr.msk.bf16.vlgmr.msra.gmra.mxu1 %vm192_vm3, %v179_v12  ;;  %v68_v43 = vld [vmem:[%s2793_s9] sm:$0xff] }
   0xa   :  { %1941 = vmatpush3.bf16.msra.mxu1 %v2362_v3  ;;  %1944 = vmatprep.mubr.msk.bf16.mxu1 %vm2280_vm1, %v2279_v1  ;;  %v339_v44 = vpack.c.bf16 %v68_v43, %v68_v43  ;;  %v2467_v50 = vld [vmem:[%s2792_s6] sm:$0xff]  }
   0xb   :  { %1942 = vmatprep.subr.bf16.mxu1 %v2279_v1  ;;  %1928 = vmatprep.mubr.msk.bf16.mxu0 %vm88_vm2, %v80_v38  ;;  %v2495_v5 = vld [vmem:[%s2794_s8] ss:$0 sm:$0xff] }
   0xc   :  { %1951 = vmatpush3.bf16.msra.mxu0 %v2437_v41 }
   0xd   :  { %1964 = vmatprep.subr.bf16.mxu0 %v2279_v1 }
   0xe   :  { %1943 = vmatpush3.bf16.msra.mxu1 %v2380_v10  ;;  %1929 = vmatmul.mubr.msk.bf16.gmra.mxu0 %vm88_vm2, %v81_v40 }
   0xf   :  { %1956 = vmatprep.subr.bf16.mxu1 %v2279_v1  ;;  %1952 = vmatprep.mubr.msk.bf16.mxu0 %vm2280_vm1, %v2279_v1 }
  0x16   :  { %1953 = vmatmul.mubr.msk.bf16.vlgmr.msra.gmra.mxu0 %vm192_vm3, %v339_v44 }
  0x17   :  { %1965 = vmatpush3.bf16.msra.mxu0 %v2362_v3  ;;  %1968 = vmatprep.mubr.msk.bf16.mxu0 %vm2280_vm1, %v2279_v1 }
  0x18   :  { %1966 = vmatprep.subr.bf16.mxu0 %v2279_v1 }
  0x1b   :  { %1967 = vmatpush3.bf16.msra.mxu0 %v2380_v10 }
  0x1c   :  { %1980 = vmatprep.subr.bf16.mxu0 %v2279_v1 }
  0xc6   :  { %v2398_v13 = vpop.f32.mrf.mxu0 }
  0xc8   :  { %v139_v15 = vpop.f32.mrf.mxu0 }
  0xc9   :  { %v140_v16 = vadd.f32 %v2403_v14, %v139_v15  ;;  %v230_v17 = vpop.f32.mrf.mxu1 }
  0xca   :  { %v2481_v51 = vpop.f32.mrf.mxu0 }
  0xcb   :  { %v236_v18 = vadd.f32 %v230_v17, %v140_v16  ;;  %v1938_v19 = vpop.f32.mrf.mxu1  ;;  %v69_v17 = vld [vmem:[%s2795_s10] sm:$0xff] }
  0xcc   :  { %v142_v52 = vpop.f32.mrf.mxu0 }
  0xcd   :  { %2145 = vtanh.f32 %v236_v18  ;;  %v233_v20 = vpop.f32.mrf.mxu1  ;;  %v1795_v24 = vmul.f32 -1.442695, %v236_v18  ;;  %v143_v61 = vadd.f32 %v2403_v14, %v142_v52  ;;  %v148_v52 = vadd.f32 %v2398_v13, %v2403_v14 }
  0xce   :  { %v2483_v53 = vpop.f32.mrf.mxu0 }
  0xcf   :  { %v1939_v21 = vpop.f32.mrf.mxu1  ;;  %2147 = vpow2.f32 %v1795_v24 }
  0xd0   :  { %v2485_v54 = vpop.f32.mrf.mxu0 }
  0xd2   :  { %v2487_v55 = vpop.f32.mrf.mxu0 }
  0xd4   :  { %v2489_v56 = vpop.f32.mrf.mxu0 }
  0xd6   :  { %v389_v57 = vpop.f32.mrf.mxu0 }
  0xd8   :  { %v1954_v58 = vpop.f32.mrf.mxu0 }
  0xda   :  { %v2146_v22 = vpop.eup %2145  ;;  %v392_v59 = vpop.f32.mrf.mxu0 }
  0xdb   :  { %250 = vrot.lane.b32.xlu0 %v2146_v22, %s2281_s24 }
  0xdc   :  { %v2148_v25 = vpop.eup %2147  ;;  %v1955_v60 = vpop.f32.mrf.mxu0 }
  0xdd   :  { %v240_v26 = vadd.f32 1.0, %v2148_v25 }
  0xdf   :  { %245 = vrot.lane.b32.xlu0 %v52_v23, %s2282_s27  ;;  %2149 = vrcp.f32 %v240_v26 }
  0xec   :  { %v2150_v27 = vpop.eup %2149 }
 0x14d   :  { %v251_v28 = vpop.permute.xlu0 %250 }
 0x14e   :  { %v253_v29 = vmul.f32 %v2150_v27, %v251_v28 }
 0x150   :  { %255 = vrot.lane.b32.xlu1 %v253_v29, %s2282_s27 }
 0x151   :  { %v246_v30 = vpop.permute.xlu0 %245 }
 0x152   :  { %v248_v31 = vmul.f32 %v2150_v27, %v246_v30 }
 0x1c2   :  { %v256_v32 = vpop.permute.xlu1 %255 }
 0x1c3   :  { %v2412_v33 = vadd.f32 %v256_v32, %v248_v31 }
 0x1c5   :  { %2151 = vtanh.f32 %v2412_v33 }
 0x1d2   :  { %v2152_v42 = vpop.eup %2151 }
 0x1d3   :  { %261 = vrot.lane.b32.xlu1 %v2152_v42, %s2281_s24 }
 0x245   :  { %v262_v45 = vpop.permute.xlu1 %261 }
 0x246   :  { %v264_v46 = vmul.f32 %v2150_v27, %v262_v45 }
 0x248   :  { %v267_v47 = vpack.c.bf16 %v264_v46, %v264_v46 }
 0x24a   :  { %269 = vrot.lane.b32.xlu0 %v267_v47, %s2282_s27 }
 0x2bc   :  { %v270_v49 = vpop.permute.xlu0 %269 }
 0x2bd   :  { %1945 = vmatmul.mubr.msk.bf16.vlgmr.msra.gmra.mxu1 %vm192_vm3, %v270_v49 }
 0x2be   :  { %1957 = vmatpush3.bf16.msra.mxu1 %v2460_v48  ;;  %1960 = vmatprep.mubr.msk.bf16.mxu1 %vm2280_vm1, %v2279_v1 }
 0x2bf   :  { %1958 = vmatprep.subr.bf16.mxu1 %v2279_v1 }
 0x2c2   :  { %1959 = vmatpush3.bf16.msra.mxu1 %v2467_v50 }
 0x2c3   :  { %1972 = vmatprep.subr.bf16.mxu1 %v2279_v1 }
 0x2c5   :  { %1961 = vmatmul.mubr.msk.bf16.vlgmr.msra.gmra.mxu1 %vm192_vm3, %v270_v49 }
 0x2c6   :  { %1973 = vmatpush3.bf16.msra.mxu1 %v2427_v37  ;;  %1976 = vmatprep.mubr.msk.bf16.mxu1 %vm2280_vm1, %v2279_v1 }
 0x2c7   :  { %1974 = vmatprep.subr.bf16.mxu1 %v2279_v1 }
 0x2ca   :  { %1975 = vmatpush3.bf16.msra.mxu1 %v2437_v41 }
 0x2cb   :  { %1988 = vmatprep.subr.bf16.mxu1 %v2279_v1 }
 0x37d   :  { %v308_v62 = vpop.f32.mrf.mxu1 }
 0x37e   :  { %v314_v63 = vadd.f32 %v308_v62, %v143_v61 }
 0x37f   :  { %v1946_v0 = vpop.f32.mrf.mxu1 }
 0x380   :  { %2153 = vtanh.f32 %v314_v63  ;;  %v1797_v18 = vmul.f32 -1.442695, %v314_v63 }
 0x381   :  { %v311_v2 = vpop.f32.mrf.mxu1 }
 0x383   :  { %v1947_v4 = vpop.f32.mrf.mxu1 }
 0x385   :  { %v441_v6 = vpop.f32.mrf.mxu1 }
 0x386   :  { %v442_v7 = vadd.f32 %v441_v6, %v389_v57 }
 0x387   :  { %v1962_v8 = vpop.f32.mrf.mxu1 }
 0x388   :  { %v447_v9 = vadd.f32 %v2495_v5, %v442_v7 }
 0x389   :  { %v444_v11 = vpop.f32.mrf.mxu1 }
 0x38a   :  { %2155 = vtanh.f32 %v447_v9  ;;  %v1804_v19 = vmul.f32 -1.442695, %v447_v9 }
 0x38b   :  { %v1963_v12 = vpop.f32.mrf.mxu1  ;;  %2157 = vpow2.f32 %v1797_v18 }
 0x38c   :  { %2159 = vpow2.f32 %v1804_v19 }
 0x38d   :  { %v2154_v15 = vpop.eup %2153 }
 0x38e   :  { %324 = vrot.lane.b32.xlu1 %v2154_v15, %s2281_s24 }
 0x397   :  { %v2156_v16 = vpop.eup %2155 }
 0x398   :  { %461 = vrot.lane.b32.xlu0 %v2156_v16, %s2281_s24  ;;  %v2158_v20 = vpop.eup %2157 }
 0x399   :  { %v318_v21 = vadd.f32 1.0, %v2158_v20  ;;  %v2160_v22 = vpop.eup %2159 }
 0x39a   :  { %v451_v23 = vadd.f32 1.0, %v2160_v22 }
 0x39b   :  { %2161 = vrcp.f32 %v318_v21 }
 0x39c   :  { %456 = vrot.lane.b32.xlu0 %v69_v17, %s2282_s27  ;;  %2163 = vrcp.f32 %v451_v23 }
 0x3a8   :  { %v2162_v24 = vpop.eup %2161 }
 0x3a9   :  { %v2164_v27 = vpop.eup %2163  ;;  %v322_v30 = vmul.f32 %v2162_v24, %v2412_v33 }
 0x400   :  { %v325_v25 = vpop.permute.xlu1 %324 }
 0x401   :  { %v327_v26 = vmul.f32 %v2162_v24, %v325_v25 }
 0x403   :  { %329 = vrot.lane.b32.xlu1 %v327_v26, %s2282_s27 }
 0x40a   :  { %v462_v28 = vpop.permute.xlu0 %461 }
 0x40b   :  { %v464_v29 = vmul.f32 %v2164_v27, %v462_v28 }
 0x40d   :  { %466 = vrot.lane.b32.xlu1 %v464_v29, %s2282_s27 }
 0x40e   :  { %v457_v34 = vpop.permute.xlu0 %456 }
 0x40f   :  { %v459_v35 = vmul.f32 %v2164_v27, %v457_v34 }
 0x475   :  { %v330_v31 = vpop.permute.xlu1 %329 }
 0x476   :  { %v2507_v32 = vadd.f32 %v330_v31, %v322_v30 }
 0x478   :  { %2165 = vtanh.f32 %v2507_v32 }
 0x47f   :  { %v467_v36 = vpop.permute.xlu1 %466 }
 0x480   :  { %v2510_v38 = vadd.f32 %v467_v36, %v459_v35 }
 0x482   :  { %2167 = vtanh.f32 %v2510_v38 }
 0x485   :  { %v2166_v39 = vpop.eup %2165 }
 0x486   :  { %335 = vrot.lane.b32.xlu0 %v2166_v39, %s2281_s24 }
 0x48f   :  { %v2168_v40 = vpop.eup %2167 }
 0x490   :  { %472 = vrot.lane.b32.xlu1 %v2168_v40, %s2281_s24 }
 0x4f8   :  { %v336_v42 = vpop.permute.xlu0 %335 }
 0x4f9   :  { %v338_v33 = vmul.f32 %v2162_v24, %v336_v42 }
 0x4fb   :  { %v478_v43 = vpack.c.bf16 %v338_v33, %v338_v33 }
 0x4fd   :  { %480 = vrot.lane.b32.xlu0 %v478_v43, %s2282_s27 }
 0x502   :  { %v473_v44 = vpop.permute.xlu1 %472 }
 0x503   :  { %v475_v45 = vmul.f32 %v2164_v27, %v473_v44 }
 0x505   :  { %v550_v46 = vpack.c.bf16 %v475_v45, %v475_v45  ;;  %v151_v45 = vadd.f32 %v2481_v51, %v2403_v14 }
 0x507   :  { %552 = vrot.lane.b32.xlu1 %v550_v46, %s2282_s27 }
 0x56f   :  { %v481_v47 = vpop.permute.xlu0 %480 }
 0x570   :  { %1969 = vmatmul.mubr.msk.bf16.vlgmr.msra.gmra.mxu0 %vm192_vm3, %v481_v47 }
 0x571   :  { %1981 = vmatpush3.bf16.msra.mxu0 %v2460_v48  ;;  %1984 = vmatprep.mubr.msk.bf16.mxu0 %vm2280_vm1, %v2279_v1 }
 0x572   :  { %1982 = vmatprep.subr.bf16.mxu0 %v2279_v1 }
 0x575   :  { %1983 = vmatpush3.bf16.msra.mxu0 %v2467_v50 }
 0x576   :  { %1996 = vmatprep.subr.bf16.mxu0 %v2279_v1 }
 0x578   :  { %1985 = vmatmul.mubr.msk.bf16.vlgmr.msra.gmra.mxu0 %vm192_vm3, %v481_v47 }
 0x579   :  { %v553_v49 = vpop.permute.xlu1 %552  ;;  %1997 = vmatpush3.bf16.msra.mxu0 %v2427_v37  ;;  %2000 = vmatprep.mubr.msk.bf16.mxu0 %vm2280_vm1, %v2279_v1 }
 0x57a   :  { %1977 = vmatmul.mubr.msk.bf16.vlgmr.msra.gmra.mxu1 %vm192_vm3, %v553_v49  ;;  %1998 = vmatprep.subr.bf16.mxu0 %v2279_v1 }
 0x57b   :  { %1989 = vmatpush3.bf16.msra.mxu1 %v2362_v3  ;;  %1992 = vmatprep.mubr.msk.bf16.mxu1 %vm2280_vm1, %v2279_v1 }
 0x57c   :  { %1990 = vmatprep.subr.bf16.mxu1 %v2279_v1 }
 0x57d   :  { %1999 = vmatpush3.bf16.msra.mxu0 %v2437_v41 }
 0x57e   :  { %2012 = vmatprep.subr.bf16.mxu0 %v2279_v1 }
 0x57f   :  { %1991 = vmatpush3.bf16.msra.mxu1 %v2380_v10 }
 0x580   :  { %2004 = vmatprep.subr.bf16.mxu1 %v2279_v1 }
 0x630   :  { %v519_v57 = vpop.f32.mrf.mxu0 }
 0x631   :  { %v525_v58 = vadd.f32 %v519_v57, %v148_v52 }
 0x632   :  { %v1970_v59 = vpop.f32.mrf.mxu0 }
 0x633   :  { %2169 = vtanh.f32 %v525_v58  ;;  %v1806_v15 = vmul.f32 -1.442695, %v525_v58 }
 0x634   :  { %v522_v60 = vpop.f32.mrf.mxu0 }
 0x636   :  { %v1971_v61 = vpop.f32.mrf.mxu0 }
 0x638   :  { %v631_v62 = vpop.f32.mrf.mxu0 }
 0x63a   :  { %v591_v63 = vpop.f32.mrf.mxu1  ;;  %v1986_v0 = vpop.f32.mrf.mxu0 }
 0x63b   :  { %v632_v2 = vadd.f32 %v631_v62, %v591_v63 }
 0x63c   :  { %v1978_v4 = vpop.f32.mrf.mxu1  ;;  %v634_v6 = vpop.f32.mrf.mxu0 }
 0x63d   :  { %v637_v7 = vadd.f32 %v2495_v5, %v632_v2 }
 0x63e   :  { %v594_v8 = vpop.f32.mrf.mxu1  ;;  %v1987_v9 = vpop.f32.mrf.mxu0 }
 0x63f   :  { %2171 = vtanh.f32 %v637_v7  ;;  %v1809_v16 = vmul.f32 -1.442695, %v637_v7 }
 0x640   :  { %v2170_v11 = vpop.eup %2169  ;;  %v1979_v12 = vpop.f32.mrf.mxu1  ;;  %2173 = vpow2.f32 %v1806_v15 }
 0x641   :  { %535 = vrot.lane.b32.xlu0 %v2170_v11, %s2281_s24  ;;  %2175 = vpow2.f32 %v1809_v16 }
 0x64c   :  { %v2172_v13 = vpop.eup %2171 }
 0x64d   :  { %647 = vrot.lane.b32.xlu1 %v2172_v13, %s2281_s24  ;;  %v2174_v17 = vpop.eup %2173 }
 0x64e   :  { %v529_v18 = vadd.f32 1.0, %v2174_v17  ;;  %v2176_v19 = vpop.eup %2175 }
 0x64f   :  { %v641_v20 = vadd.f32 1.0, %v2176_v19 }
 0x650   :  { %2177 = vrcp.f32 %v529_v18 }
 0x651   :  { %2179 = vrcp.f32 %v641_v20 }
 0x65d   :  { %v2178_v21 = vpop.eup %2177 }
 0x65e   :  { %v2180_v24 = vpop.eup %2179  ;;  %v533_v27 = vmul.f32 %v2178_v21, %v2507_v32 }
 0x65f   :  { %v645_v30 = vmul.f32 %v2180_v24, %v2510_v38 }
 0x6b3   :  { %v536_v22 = vpop.permute.xlu0 %535 }
 0x6b4   :  { %v538_v23 = vmul.f32 %v2178_v21, %v536_v22 }
 0x6b6   :  { %540 = vrot.lane.b32.xlu0 %v538_v23, %s2282_s27 }
 0x6bf   :  { %v648_v25 = vpop.permute.xlu1 %647 }
 0x6c0   :  { %v650_v26 = vmul.f32 %v2180_v24, %v648_v25 }
 0x6c2   :  { %652 = vrot.lane.b32.xlu1 %v650_v26, %s2282_s27 }
 0x728   :  { %v541_v28 = vpop.permute.xlu0 %540 }
 0x729   :  { %v2546_v29 = vadd.f32 %v541_v28, %v533_v27 }
 0x72b   :  { %2181 = vtanh.f32 %v2546_v29 }
 0x734   :  { %v653_v31 = vpop.permute.xlu1 %652 }
 0x735   :  { %v2550_v34 = vadd.f32 %v653_v31, %v645_v30 }
 0x737   :  { %2183 = vtanh.f32 %v2550_v34 }
 0x738   :  { %v2182_v35 = vpop.eup %2181 }
 0x739   :  { %546 = vrot.lane.b32.xlu0 %v2182_v35, %s2281_s24 }
 0x744   :  { %v2184_v36 = vpop.eup %2183 }
 0x745   :  { %658 = vrot.lane.b32.xlu1 %v2184_v36, %s2281_s24 }
 0x7ab   :  { %v547_v39 = vpop.permute.xlu0 %546 }
 0x7ac   :  { %v549_v32 = vmul.f32 %v2178_v21, %v547_v39 }
 0x7ae   :  { %v664_v40 = vpack.c.bf16 %v549_v32, %v549_v32 }
 0x7b0   :  { %666 = vrot.lane.b32.xlu0 %v664_v40, %s2282_s27 }
 0x7b7   :  { %v659_v42 = vpop.permute.xlu1 %658 }
 0x7b8   :  { %v661_v33 = vmul.f32 %v2180_v24, %v659_v42  ;;  %v156_v42 = vadd.f32 %v2403_v14, %v2485_v54 }
 0x7ba   :  { %v736_v43 = vpack.c.bf16 %v661_v33, %v661_v33 }
 0x7bc   :  { %738 = vrot.lane.b32.xlu1 %v736_v43, %s2282_s27 }
 0x822   :  { %v667_v38 = vpop.permute.xlu0 %666 }
 0x823   :  { %1993 = vmatmul.mubr.msk.bf16.vlgmr.msra.gmra.mxu1 %vm192_vm3, %v667_v38 }
 0x824   :  { %2005 = vmatpush3.bf16.msra.mxu1 %v2460_v48  ;;  %2008 = vmatprep.mubr.msk.bf16.mxu1 %vm2280_vm1, %v2279_v1 }
 0x825   :  { %2006 = vmatprep.subr.bf16.mxu1 %v2279_v1 }
 0x828   :  { %2007 = vmatpush3.bf16.msra.mxu1 %v2467_v50 }
 0x829   :  { %2020 = vmatprep.subr.bf16.mxu1 %v2279_v1 }
 0x82b   :  { %2009 = vmatmul.mubr.msk.bf16.vlgmr.msra.gmra.mxu1 %vm192_vm3, %v667_v38 }
 0x82c   :  { %2021 = vmatpush3.bf16.msra.mxu1 %v2427_v37  ;;  %2024 = vmatprep.mubr.msk.bf16.mxu1 %vm2280_vm1, %v2279_v1 }
 0x82d   :  { %2022 = vmatprep.subr.bf16.mxu1 %v2279_v1 }
 0x82e   :  { %v739_v44 = vpop.permute.xlu1 %738 }
 0x82f   :  { %2001 = vmatmul.mubr.msk.bf16.vlgmr.msra.gmra.mxu0 %vm192_vm3, %v739_v44 }
 0x830   :  { %2013 = vmatpush3.bf16.msra.mxu0 %v2362_v3  ;;  %2016 = vmatprep.mubr.msk.bf16.mxu0 %vm2280_vm1, %v2279_v1 }
 0x831   :  { %2014 = vmatprep.subr.bf16.mxu0 %v2279_v1  ;;  %2023 = vmatpush3.bf16.msra.mxu1 %v2437_v41 }
 0x832   :  { %2036 = vmatprep.subr.bf16.mxu1 %v2279_v1 }
 0x834   :  { %2015 = vmatpush3.bf16.msra.mxu0 %v2380_v10 }
 0x835   :  { %2028 = vmatprep.subr.bf16.mxu0 %v2279_v1 }
 0x8e3   :  { %v705_v46 = vpop.f32.mrf.mxu1 }
 0x8e4   :  { %v711_v47 = vadd.f32 %v705_v46, %v151_v45 }
 0x8e5   :  { %v1994_v49 = vpop.f32.mrf.mxu1 }
 0x8e6   :  { %2185 = vtanh.f32 %v711_v47  ;;  %v1811_v8 = vmul.f32 -1.442695, %v711_v47 }
 0x8e7   :  { %v708_v52 = vpop.f32.mrf.mxu1 }
 0x8e9   :  { %v1995_v57 = vpop.f32.mrf.mxu1 }
 0x8eb   :  { %v817_v58 = vpop.f32.mrf.mxu1 }
 0x8ed   :  { %v2010_v59 = vpop.f32.mrf.mxu1 }
 0x8ef   :  { %v777_v60 = vpop.f32.mrf.mxu0  ;;  %v820_v61 = vpop.f32.mrf.mxu1 }
 0x8f0   :  { %v818_v62 = vadd.f32 %v817_v58, %v777_v60 }
 0x8f1   :  { %v2002_v63 = vpop.f32.mrf.mxu0  ;;  %v2011_v0 = vpop.f32.mrf.mxu1 }
 0x8f2   :  { %v823_v2 = vadd.f32 %v2495_v5, %v818_v62 }
 0x8f3   :  { %v2186_v4 = vpop.eup %2185  ;;  %v780_v6 = vpop.f32.mrf.mxu0 }
 0x8f4   :  { %2187 = vtanh.f32 %v823_v2  ;;  %721 = vrot.lane.b32.xlu0 %v2186_v4, %s2281_s24  ;;  %v1814_v9 = vmul.f32 -1.442695, %v823_v2 }
 0x8f5   :  { %v2003_v51 = vpop.f32.mrf.mxu0  ;;  %2189 = vpow2.f32 %v1811_v8 }
 0x8f6   :  { %2191 = vpow2.f32 %v1814_v9 }
 0x901   :  { %v2188_v7 = vpop.eup %2187 }
 0x902   :  { %833 = vrot.lane.b32.xlu1 %v2188_v7, %s2281_s24  ;;  %v2190_v11 = vpop.eup %2189 }
 0x903   :  { %v715_v12 = vadd.f32 1.0, %v2190_v11  ;;  %v2192_v13 = vpop.eup %2191 }
 0x904   :  { %v827_v15 = vadd.f32 1.0, %v2192_v13 }
 0x905   :  { %2193 = vrcp.f32 %v715_v12 }
 0x906   :  { %2195 = vrcp.f32 %v827_v15 }
 0x912   :  { %v2194_v16 = vpop.eup %2193 }
 0x913   :  { %v2196_v19 = vpop.eup %2195  ;;  %v719_v22 = vmul.f32 %v2194_v16, %v2546_v29 }
 0x914   :  { %v831_v25 = vmul.f32 %v2196_v19, %v2550_v34 }
 0x966   :  { %v722_v17 = vpop.permute.xlu0 %721 }
 0x967   :  { %v724_v18 = vmul.f32 %v2194_v16, %v722_v17 }
 0x969   :  { %726 = vrot.lane.b32.xlu0 %v724_v18, %s2282_s27 }
 0x974   :  { %v834_v20 = vpop.permute.xlu1 %833 }
 0x975   :  { %v836_v21 = vmul.f32 %v2196_v19, %v834_v20 }
 0x977   :  { %838 = vrot.lane.b32.xlu1 %v836_v21, %s2282_s27 }
 0x9db   :  { %v727_v23 = vpop.permute.xlu0 %726 }
 0x9dc   :  { %v2586_v24 = vadd.f32 %v727_v23, %v719_v22 }
 0x9de   :  { %2197 = vtanh.f32 %v2586_v24 }
 0x9e9   :  { %v839_v26 = vpop.permute.xlu1 %838 }
 0x9ea   :  { %v2590_v27 = vadd.f32 %v839_v26, %v831_v25 }
 0x9eb   :  { %v2198_v28 = vpop.eup %2197 }
 0x9ec   :  { %2199 = vtanh.f32 %v2590_v27  ;;  %732 = vrot.lane.b32.xlu0 %v2198_v28, %s2281_s24 }
 0x9f9   :  { %v2200_v30 = vpop.eup %2199 }
 0x9fa   :  { %844 = vrot.lane.b32.xlu1 %v2200_v30, %s2281_s24 }
 0xa5e   :  { %v733_v31 = vpop.permute.xlu0 %732 }
 0xa5f   :  { %v735_v29 = vmul.f32 %v2194_v16, %v733_v31 }
 0xa61   :  { %v850_v35 = vpack.c.bf16 %v735_v29, %v735_v29 }
 0xa63   :  { %852 = vrot.lane.b32.xlu0 %v850_v35, %s2282_s27  ;;  %v159_v35 = vadd.f32 %v2403_v14, %v2489_v56 }
 0xa6c   :  { %v845_v36 = vpop.permute.xlu1 %844 }
 0xa6d   :  { %v847_v39 = vmul.f32 %v2196_v19, %v845_v36 }
 0xa6f   :  { %v922_v32 = vpack.c.bf16 %v847_v39, %v847_v39 }
 0xa71   :  { %924 = vrot.lane.b32.xlu1 %v922_v32, %s2282_s27 }
 0xad5   :  { %v853_v34 = vpop.permute.xlu0 %852 }
 0xad6   :  { %2017 = vmatmul.mubr.msk.bf16.vlgmr.msra.gmra.mxu0 %vm192_vm3, %v853_v34 }
 0xad7   :  { %2029 = vmatpush3.bf16.msra.mxu0 %v2460_v48  ;;  %2032 = vmatprep.mubr.msk.bf16.mxu0 %vm2280_vm1, %v2279_v1 }
 0xad8   :  { %2030 = vmatprep.subr.bf16.mxu0 %v2279_v1 }
 0xadb   :  { %2031 = vmatpush3.bf16.msra.mxu0 %v2467_v50 }
 0xadc   :  { %2044 = vmatprep.subr.bf16.mxu0 %v2279_v1 }
 0xade   :  { %2033 = vmatmul.mubr.msk.bf16.vlgmr.msra.gmra.mxu0 %vm192_vm3, %v853_v34 }
 0xadf   :  { %2045 = vmatpush3.bf16.msra.mxu0 %v2427_v37  ;;  %2048 = vmatprep.mubr.msk.bf16.mxu0 %vm2280_vm1, %v2279_v1 }
 0xae0   :  { %2046 = vmatprep.subr.bf16.mxu0 %v2279_v1 }
 0xae3   :  { %v925_v40 = vpop.permute.xlu1 %924  ;;  %2047 = vmatpush3.bf16.msra.mxu0 %v2437_v41 }
 0xae4   :  { %2025 = vmatmul.mubr.msk.bf16.vlgmr.msra.gmra.mxu1 %vm192_vm3, %v925_v40  ;;  %2060 = vmatprep.subr.bf16.mxu0 %v2279_v1 }
 0xae5   :  { %2037 = vmatpush3.bf16.msra.mxu1 %v2362_v3  ;;  %2040 = vmatprep.mubr.msk.bf16.mxu1 %vm2280_vm1, %v2279_v1 }
 0xae6   :  { %2038 = vmatprep.subr.bf16.mxu1 %v2279_v1 }
 0xae9   :  { %2039 = vmatpush3.bf16.msra.mxu1 %v2380_v10 }
 0xaea   :  { %2052 = vmatprep.subr.bf16.mxu1 %v2279_v1 }
 0xb96   :  { %v891_v33 = vpop.f32.mrf.mxu0 }
 0xb97   :  { %v897_v43 = vadd.f32 %v891_v33, %v156_v42 }
 0xb98   :  { %v2018_v38 = vpop.f32.mrf.mxu0 }
 0xb99   :  { %2201 = vtanh.f32 %v897_v43  ;;  %v1816_v0 = vmul.f32 -1.442695, %v897_v43 }
 0xb9a   :  { %v894_v44 = vpop.f32.mrf.mxu0 }
 0xb9c   :  { %v2019_v45 = vpop.f32.mrf.mxu0 }
 0xb9e   :  { %v1003_v46 = vpop.f32.mrf.mxu0 }
 0xba0   :  { %v2034_v47 = vpop.f32.mrf.mxu0 }
 0xba2   :  { %v1006_v49 = vpop.f32.mrf.mxu0 }
 0xba4   :  { %v963_v52 = vpop.f32.mrf.mxu1  ;;  %v2035_v57 = vpop.f32.mrf.mxu0 }
 0xba5   :  { %v1004_v58 = vadd.f32 %v1003_v46, %v963_v52 }
 0xba6   :  { %v2202_v59 = vpop.eup %2201  ;;  %v2026_v60 = vpop.f32.mrf.mxu1 }
 0xba7   :  { %v1009_v61 = vadd.f32 %v2495_v5, %v1004_v58  ;;  %907 = vrot.lane.b32.xlu0 %v2202_v59, %s2281_s24 }
 0xba8   :  { %v966_v62 = vpop.f32.mrf.mxu1 }
 0xba9   :  { %2203 = vtanh.f32 %v1009_v61  ;;  %v1819_v2 = vmul.f32 -1.442695, %v1009_v61 }
 0xbaa   :  { %v2027_v54 = vpop.f32.mrf.mxu1  ;;  %2205 = vpow2.f32 %v1816_v0 }
 0xbab   :  { %2207 = vpow2.f32 %v1819_v2 }
 0xbb6   :  { %v2204_v63 = vpop.eup %2203 }
 0xbb7   :  { %1019 = vrot.lane.b32.xlu1 %v2204_v63, %s2281_s24  ;;  %v2206_v4 = vpop.eup %2205 }
 0xbb8   :  { %v901_v6 = vadd.f32 1.0, %v2206_v4  ;;  %v2208_v51 = vpop.eup %2207 }
 0xbb9   :  { %v1013_v7 = vadd.f32 1.0, %v2208_v51 }
 0xbba   :  { %2209 = vrcp.f32 %v901_v6 }
 0xbbb   :  { %2211 = vrcp.f32 %v1013_v7 }
 0xbc7   :  { %v2210_v8 = vpop.eup %2209 }
 0xbc8   :  { %v2212_v12 = vpop.eup %2211  ;;  %v905_v16 = vmul.f32 %v2210_v8, %v2586_v24 }
 0xbc9   :  { %v1017_v19 = vmul.f32 %v2212_v12, %v2590_v27 }
 0xc19   :  { %v908_v9 = vpop.permute.xlu0 %907 }
 0xc1a   :  { %v910_v11 = vmul.f32 %v2210_v8, %v908_v9 }
 0xc1c   :  { %912 = vrot.lane.b32.xlu0 %v910_v11, %s2282_s27 }
 0xc29   :  { %v1020_v13 = vpop.permute.xlu1 %1019 }
 0xc2a   :  { %v1022_v15 = vmul.f32 %v2212_v12, %v1020_v13 }
 0xc2c   :  { %1024 = vrot.lane.b32.xlu1 %v1022_v15, %s2282_s27 }
 0xc8e   :  { %v913_v17 = vpop.permute.xlu0 %912 }
 0xc8f   :  { %v2626_v18 = vadd.f32 %v913_v17, %v905_v16 }
 0xc91   :  { %2213 = vtanh.f32 %v2626_v18 }
 0xc9e   :  { %v2214_v20 = vpop.eup %2213  ;;  %v1025_v21 = vpop.permute.xlu1 %1024 }
 0xc9f   :  { %v2630_v22 = vadd.f32 %v1025_v21, %v1017_v19  ;;  %918 = vrot.lane.b32.xlu0 %v2214_v20, %s2281_s24 }
 0xca1   :  { %2215 = vtanh.f32 %v2630_v22 }
 0xcae   :  { %v2216_v23 = vpop.eup %2215 }
 0xcaf   :  { %1030 = vrot.lane.b32.xlu1 %v2216_v23, %s2281_s24  ;;  %v2273_v23 = vld [vmem:[%s2786_s2 + $0x8] sm:$0xff]  }
 0xd11   :  { %v919_v25 = vpop.permute.xlu0 %918 }
 0xd12   :  { %v921_v24 = vmul.f32 %v2210_v8, %v919_v25 }
 0xd14   :  { %v1036_v26 = vpack.c.bf16 %v921_v24, %v921_v24 }
 0xd16   :  { %1038 = vrot.lane.b32.xlu0 %v1036_v26, %s2282_s27 }
 0xd21   :  { %v1031_v28 = vpop.permute.xlu1 %1030 }
 0xd22   :  { %v1033_v30 = vmul.f32 %v2212_v12, %v1031_v28 }
 0xd24   :  { %v1108_v31 = vpack.c.bf16 %v1033_v30, %v1033_v30 }
 0xd26   :  { %1110 = vrot.lane.b32.xlu1 %v1108_v31, %s2282_s27 }
 0xd88   :  { %v1039_v27 = vpop.permute.xlu0 %1038 }
 0xd89   :  { %2041 = vmatmul.mubr.msk.bf16.vlgmr.msra.gmra.mxu1 %vm192_vm3, %v1039_v27 }
 0xd8a   :  { %2053 = vmatpush3.bf16.msra.mxu1 %v2460_v48  ;;  %2056 = vmatprep.mubr.msk.bf16.mxu1 %vm2280_vm1, %v2279_v1 }
 0xd8b   :  { %2054 = vmatprep.subr.bf16.mxu1 %v2279_v1 }
 0xd8e   :  { %2055 = vmatpush3.bf16.msra.mxu1 %v2467_v50 }
 0xd8f   :  { %2068 = vmatprep.subr.bf16.mxu1 %v2279_v1 }
 0xd91   :  { %2057 = vmatmul.mubr.msk.bf16.vlgmr.msra.gmra.mxu1 %vm192_vm3, %v1039_v27 }
 0xd92   :  { %2069 = vmatpush3.bf16.msra.mxu1 %v2427_v37  ;;  %2072 = vmatprep.mubr.msk.bf16.mxu1 %vm2280_vm1, %v2279_v1 }
 0xd93   :  { %2070 = vmatprep.subr.bf16.mxu1 %v2279_v1 }
 0xd96   :  { %2071 = vmatpush3.bf16.msra.mxu1 %v2437_v41 }
 0xd97   :  { %2084 = vmatprep.subr.bf16.mxu1 %v2279_v1 }
 0xd98   :  { %v1111_v29 = vpop.permute.xlu1 %1110 }
 0xd99   :  { %2049 = vmatmul.mubr.msk.bf16.vlgmr.msra.gmra.mxu0 %vm192_vm3, %v1111_v29 }
 0xd9a   :  { %2061 = vmatpush3.bf16.msra.mxu0 %v2362_v3  ;;  %2064 = vmatprep.mubr.msk.bf16.mxu0 %vm2280_vm1, %v2279_v1 }
 0xd9b   :  { %2062 = vmatprep.subr.bf16.mxu0 %v2279_v1 }
 0xd9e   :  { %2063 = vmatpush3.bf16.msra.mxu0 %v2380_v10 }
 0xd9f   :  { %2076 = vmatprep.subr.bf16.mxu0 %v2279_v1 }
 0xe49   :  { %v1077_v36 = vpop.f32.mrf.mxu1 }
 0xe4a   :  { %v1083_v39 = vadd.f32 %v1077_v36, %v159_v35 }
 0xe4b   :  { %v2042_v32 = vpop.f32.mrf.mxu1 }
 0xe4c   :  { %2217 = vtanh.f32 %v1083_v39  ;;  %v1821_v52 = vmul.f32 -1.442695, %v1083_v39 }
 0xe4d   :  { %v1080_v34 = vpop.f32.mrf.mxu1 }
 0xe4f   :  { %v2043_v40 = vpop.f32.mrf.mxu1 }
 0xe51   :  { %v1189_v42 = vpop.f32.mrf.mxu1 }
 0xe53   :  { %v2058_v3 = vpop.f32.mrf.mxu1 }
 0xe55   :  { %v1192_v33 = vpop.f32.mrf.mxu1 }
 0xe57   :  { %v2059_v43 = vpop.f32.mrf.mxu1 }
 0xe59   :  { %v2218_v38 = vpop.eup %2217  ;;  %v1149_v44 = vpop.f32.mrf.mxu0 }
 0xe5a   :  { %v1190_v45 = vadd.f32 %v1189_v42, %v1149_v44  ;;  %1093 = vrot.lane.b32.xlu0 %v2218_v38, %s2281_s24 }
 0xe5b   :  { %v2050_v10 = vpop.f32.mrf.mxu0 }
 0xe5c   :  { %v1195_v46 = vadd.f32 %v2495_v5, %v1190_v45 }
 0xe5d   :  { %v1152_v47 = vpop.f32.mrf.mxu0 }
 0xe5e   :  { %2219 = vtanh.f32 %v1195_v46  ;;  %v1824_v58 = vmul.f32 -1.442695, %v1195_v46 }
 0xe5f   :  { %v2051_v56 = vpop.f32.mrf.mxu0  ;;  %2221 = vpow2.f32 %v1821_v52 }
 0xe60   :  { %2223 = vpow2.f32 %v1824_v58 }
 0xe6b   :  { %v2220_v49 = vpop.eup %2219 }
 0xe6c   :  { %1205 = vrot.lane.b32.xlu1 %v2220_v49, %s2281_s24  ;;  %v2222_v57 = vpop.eup %2221 }
 0xe6d   :  { %v1087_v59 = vadd.f32 1.0, %v2222_v57  ;;  %v2224_v60 = vpop.eup %2223 }
 0xe6e   :  { %v1199_v63 = vadd.f32 1.0, %v2224_v60 }
 0xe6f   :  { %2225 = vrcp.f32 %v1087_v59 }
 0xe70   :  { %2227 = vrcp.f32 %v1199_v63 }
 0xe7c   :  { %v2226_v61 = vpop.eup %2225 }
 0xe7d   :  { %v2228_v0 = vpop.eup %2227  ;;  %v1091_v6 = vmul.f32 %v2226_v61, %v2626_v18 }
 0xe7e   :  { %v1203_v9 = vmul.f32 %v2228_v0, %v2630_v22 }
 0xecc   :  { %v1094_v62 = vpop.permute.xlu0 %1093 }
 0xecd   :  { %v1096_v54 = vmul.f32 %v2226_v61, %v1094_v62 }
 0xecf   :  { %1098 = vrot.lane.b32.xlu0 %v1096_v54, %s2282_s27 }
 0xede   :  { %v1206_v2 = vpop.permute.xlu1 %1205 }
 0xedf   :  { %v1208_v4 = vmul.f32 %v2228_v0, %v1206_v2 }
 0xee1   :  { %1210 = vrot.lane.b32.xlu1 %v1208_v4, %s2282_s27 }
 0xf41   :  { %v1099_v51 = vpop.permute.xlu0 %1098 }
 0xf42   :  { %v2666_v7 = vadd.f32 %v1099_v51, %v1091_v6 }
 0xf44   :  { %2229 = vtanh.f32 %v2666_v7 }
 0xf51   :  { %v2230_v8 = vpop.eup %2229 }
 0xf52   :  { %1104 = vrot.lane.b32.xlu0 %v2230_v8, %s2281_s24 }
 0xf53   :  { %v1211_v11 = vpop.permute.xlu1 %1210 }
 0xf54   :  { %v2671_v12 = vadd.f32 %v1211_v11, %v1203_v9  ;;  %v2275_v11 = vld [vmem:[%s2791_s7 + $0x8] sm:$0xff]  }
 0xf56   :  { %2231 = vtanh.f32 %v2671_v12 }
 0xf63   :  { %v2232_v13 = vpop.eup %2231 }
 0xf64   :  { %1216 = vrot.lane.b32.xlu1 %v2232_v13, %s2281_s24 }
 0xfc4   :  { %v1105_v15 = vpop.permute.xlu0 %1104 }
 0xfc5   :  { %v1107_v16 = vmul.f32 %v2226_v61, %v1105_v15 }
 0xfc7   :  { %v1222_v17 = vpack.c.bf16 %v1107_v16, %v1107_v16 }
 0xfc9   :  { %1224 = vrot.lane.b32.xlu0 %v1222_v17, %s2282_s27 }
 0xfd6   :  { %v1217_v18 = vpop.permute.xlu1 %1216 }
 0xfd7   :  { %v1219_v19 = vmul.f32 %v2228_v0, %v1217_v18 }
 0xfd9   :  { %v1294_v20 = vpack.c.bf16 %v1219_v19, %v1219_v19 }
 0xfdb   :  { %1296 = vrot.lane.b32.xlu1 %v1294_v20, %s2282_s27 }
0x103b   :  { %v1225_v21 = vpop.permute.xlu0 %1224 }
0x103c   :  { %2065 = vmatmul.mubr.msk.bf16.vlgmr.msra.gmra.mxu0 %vm192_vm3, %v1225_v21 }
0x103d   :  { %2077 = vmatpush3.bf16.msra.mxu0 %v2460_v48  ;;  %2080 = vmatprep.mubr.msk.bf16.mxu0 %vm2280_vm1, %v2279_v1 }
0x103e   :  { %2078 = vmatprep.subr.bf16.mxu0 %v2279_v1 }
0x1041   :  { %2079 = vmatpush3.bf16.msra.mxu0 %v2467_v50 }
0x1042   :  { %2092 = vmatprep.subr.bf16.mxu0 %v2279_v1 }
0x1044   :  { %2081 = vmatmul.mubr.msk.bf16.vlgmr.msra.gmra.mxu0 %vm192_vm3, %v1225_v21 }
0x1045   :  { %2093 = vmatpush3.bf16.msra.mxu0 %v2427_v37  ;;  %2096 = vmatprep.mubr.msk.bf16.mxu0 %vm2280_vm1, %v2279_v1  ;;  %v2274_v37 = vld [vmem:[%s2786_s2] sm:$0xff]  }
0x1046   :  { %2094 = vmatprep.subr.bf16.mxu0 %v2279_v1 }
0x1049   :  { %2095 = vmatpush3.bf16.msra.mxu0 %v2437_v41  ;;  %v164_v41 = vadd.f32 %v2483_v53, %v2403_v14 }
0x104a   :  { %2108 = vmatprep.subr.bf16.mxu0 %v2279_v1 }
0x104d   :  { %v1297_v22 = vpop.permute.xlu1 %1296 }
0x104e   :  { %2073 = vmatmul.mubr.msk.bf16.vlgmr.msra.gmra.mxu1 %vm192_vm3, %v1297_v22 }
0x104f   :  { %2085 = vmatpush3.bf16.msra.mxu1 %v2273_v23  ;;  %2088 = vmatprep.mubr.msk.bf16.mxu1 %vm2280_vm1, %v2279_v1 }
0x1050   :  { %2086 = vmatprep.subr.bf16.mxu1 %v2279_v1 }
0x1053   :  { %2087 = vmatpush3.bf16.msra.mxu1 %v2274_v37 }
0x1054   :  { %2100 = vmatprep.subr.bf16.mxu1 %v2279_v1 }
0x10fc   :  { %v1263_v25 = vpop.f32.mrf.mxu0 }
0x10fd   :  { %v1269_v24 = vadd.f32 %v1263_v25, %v164_v41 }
0x10fe   :  { %v2066_v26 = vpop.f32.mrf.mxu0 }
0x10ff   :  { %2233 = vtanh.f32 %v1269_v24  ;;  %v1826_v3 = vmul.f32 -1.442695, %v1269_v24 }
0x1100   :  { %v1266_v28 = vpop.f32.mrf.mxu0 }
0x1102   :  { %v2067_v30 = vpop.f32.mrf.mxu0 }
0x1104   :  { %v1375_v31 = vpop.f32.mrf.mxu0 }
0x1106   :  { %v2082_v27 = vpop.f32.mrf.mxu0 }
0x1108   :  { %v1378_v29 = vpop.f32.mrf.mxu0 }
0x110a   :  { %v2083_v35 = vpop.f32.mrf.mxu0 }
0x110c   :  { %v2234_v36 = vpop.eup %2233 }
0x110d   :  { %1279 = vrot.lane.b32.xlu0 %v2234_v36, %s2281_s24 }
0x110e   :  { %v1335_v39 = vpop.f32.mrf.mxu1 }
0x110f   :  { %v1376_v32 = vadd.f32 %v1375_v31, %v1335_v39 }
0x1110   :  { %v2074_v34 = vpop.f32.mrf.mxu1 }
0x1111   :  { %v1381_v40 = vadd.f32 %v2495_v5, %v1376_v32 }
0x1112   :  { %v1338_v42 = vpop.f32.mrf.mxu1 }
0x1113   :  { %2235 = vtanh.f32 %v1381_v40  ;;  %v1829_v38 = vmul.f32 -1.442695, %v1381_v40 }
0x1114   :  { %v2075_v14 = vpop.f32.mrf.mxu1  ;;  %2237 = vpow2.f32 %v1826_v3 }
0x1120   :  { %v2236_v53 = vpop.eup %2235 }
0x1121   :  { %1391 = vrot.lane.b32.xlu1 %v2236_v53, %s2281_s24  ;;  %v2238_v33 = vpop.eup %2237 }
0x1122   :  { %v1273_v43 = vadd.f32 1.0, %v2238_v33 }
0x1124   :  { %2239 = vrcp.f32 %v1273_v43 }
0x1125   :  { %2241 = vpow2.f32 %v1829_v38 }
0x1131   :  { %v2240_v44 = vpop.eup %2239 }
0x1132   :  { %v2242_v10 = vpop.eup %2241  ;;  %v1277_v57 = vmul.f32 %v2240_v44, %v2666_v7 }
0x1133   :  { %v1385_v47 = vadd.f32 1.0, %v2242_v10 }
0x1135   :  { %2243 = vrcp.f32 %v1385_v47 }
0x1142   :  { %v2244_v56 = vpop.eup %2243 }
0x1143   :  { %v1389_v61 = vmul.f32 %v2244_v56, %v2671_v12 }
0x117f   :  { %v1280_v45 = vpop.permute.xlu0 %1279 }
0x1180   :  { %v1282_v46 = vmul.f32 %v2240_v44, %v1280_v45 }
0x1182   :  { %1284 = vrot.lane.b32.xlu0 %v1282_v46, %s2282_s27 }
0x1193   :  { %v1392_v49 = vpop.permute.xlu1 %1391 }
0x1194   :  { %v1394_v52 = vmul.f32 %v2244_v56, %v1392_v49 }
0x1196   :  { %1396 = vrot.lane.b32.xlu1 %v1394_v52, %s2282_s27 }
0x11f4   :  { %v1285_v58 = vpop.permute.xlu0 %1284 }
0x11f5   :  { %v2710_v59 = vadd.f32 %v1285_v58, %v1277_v57 }
0x11f7   :  { %2245 = vtanh.f32 %v2710_v59 }
0x1204   :  { %v2246_v60 = vpop.eup %2245 }
0x1205   :  { %1290 = vrot.lane.b32.xlu0 %v2246_v60, %s2281_s24 }
0x1208   :  { %v1397_v62 = vpop.permute.xlu1 %1396 }
0x1209   :  { %v2715_v54 = vadd.f32 %v1397_v62, %v1389_v61 }
0x120b   :  { %2247 = vtanh.f32 %v2715_v54 }
0x1218   :  { %v2248_v63 = vpop.eup %2247 }
0x1219   :  { %1402 = vrot.lane.b32.xlu1 %v2248_v63, %s2281_s24 }
0x1277   :  { %v1291_v0 = vpop.permute.xlu0 %1290 }
0x1278   :  { %v1293_v2 = vmul.f32 %v2240_v44, %v1291_v0 }
0x127a   :  { %v1408_v4 = vpack.c.bf16 %v1293_v2, %v1293_v2  ;;  %v2278_v2 = vld [vmem:[%s2794_s8] ss:$0 sm:$0xff] }
0x127c   :  { %1410 = vrot.lane.b32.xlu0 %v1408_v4, %s2282_s27 }
0x128b   :  { %v1403_v6 = vpop.permute.xlu1 %1402 }
0x128c   :  { %v1405_v51 = vmul.f32 %v2244_v56, %v1403_v6 }
0x128e   :  { %v1480_v7 = vpack.c.bf16 %v1405_v51, %v1405_v51 }
0x1290   :  { %1482 = vrot.lane.b32.xlu1 %v1480_v7, %s2282_s27 }
0x12ee   :  { %v1411_v8 = vpop.permute.xlu0 %1410 }
0x12ef   :  { %2089 = vmatmul.mubr.msk.bf16.vlgmr.msra.gmra.mxu1 %vm192_vm3, %v1411_v8 }
0x12f0   :  { %2101 = vmatpush3.bf16.msra.mxu1 %v2460_v48  ;;  %2104 = vmatprep.mubr.msk.bf16.mxu1 %vm2280_vm1, %v2279_v1 }
0x12f1   :  { %2102 = vmatprep.subr.bf16.mxu1 %v2279_v1 }
0x12f4   :  { %2103 = vmatpush3.bf16.msra.mxu1 %v2467_v50 }
0x12f5   :  { %2116 = vmatprep.subr.bf16.mxu1 %v2279_v1 }
0x12f7   :  { %2105 = vmatmul.mubr.msk.bf16.vlgmr.msra.gmra.mxu1 %vm192_vm3, %v1411_v8 }
0x12f8   :  { %2117 = vmatpush3.bf16.msra.mxu1 %v2460_v48  ;;  %2120 = vmatprep.mubr.msk.bf16.mxu1 %vm2280_vm1, %v2279_v1  ;;  %v2276_v48 = vld [vmem:[%s2791_s7] sm:$0xff]  }
0x12f9   :  { %2118 = vmatprep.subr.bf16.mxu1 %v2279_v1 }
0x12fc   :  { %2119 = vmatpush3.bf16.msra.mxu1 %v2467_v50  ;;  %v2277_v50 = vld [vmem:[%s2789_s3] ss:$0 sm:$0xff] }
0x12fd   :  { %v167_v12 = vadd.f32 %v2277_v50, %v2487_v55 }
0x1302   :  { %v1483_v9 = vpop.permute.xlu1 %1482 }
0x1303   :  { %2097 = vmatmul.mubr.msk.bf16.vlgmr.msra.gmra.mxu0 %vm192_vm3, %v1483_v9 }
0x1304   :  { %2109 = vmatpush3.bf16.msra.mxu0 %v2275_v11  ;;  %2112 = vmatprep.mubr.msk.bf16.mxu0 %vm2280_vm1, %v2279_v1 }
0x1305   :  { %2110 = vmatprep.subr.bf16.mxu0 %v2279_v1 }
0x1308   :  { %2111 = vmatpush3.bf16.msra.mxu0 %v2276_v48 }
0x1309   :  { %2124 = vmatprep.subr.bf16.mxu0 %v2279_v1 }
0x13af   :  { %v1449_v13 = vpop.f32.mrf.mxu1 }
0x13b0   :  { %v1455_v15 = vadd.f32 %v1449_v13, %v167_v12 }
0x13b1   :  { %v2090_v16 = vpop.f32.mrf.mxu1 }
0x13b2   :  { %2249 = vtanh.f32 %v1455_v15  ;;  %v1831_v30 = vmul.f32 -1.442695, %v1455_v15 }
0x13b3   :  { %v1452_v17 = vpop.f32.mrf.mxu1 }
0x13b4   :  { %v2143_v17 = vld [vmem:[%s2796_s11 + $0x8] sm:$0xff]  }
0x13b5   :  { %v2091_v18 = vpop.f32.mrf.mxu1 }
0x13b6   :  { %v2144_v18 = vld [vmem:[%s2796_s11] sm:$0xff]  }
0x13b7   :  { %v1561_v19 = vpop.f32.mrf.mxu1 }
0x13b9   :  { %v2106_v20 = vpop.f32.mrf.mxu1 }
0x13bb   :  { %v1564_v21 = vpop.f32.mrf.mxu1 }
0x13bd   :  { %v2107_v22 = vpop.f32.mrf.mxu1 }
0x13bf   :  { %v2250_v23 = vpop.eup %2249 }
0x13c0   :  { %1465 = vrot.lane.b32.xlu0 %v2250_v23, %s2281_s24 }
0x13c3   :  { %v1521_v37 = vpop.f32.mrf.mxu0 }
0x13c4   :  { %v1562_v41 = vadd.f32 %v1561_v19, %v1521_v37  ;;  %v1838_v37 = vld [vmem:[%s2797_s12] ss:$0 sm:$0xff] }
0x13c5   :  { %v2098_v25 = vpop.f32.mrf.mxu0 }
0x13c6   :  { %v1567_v24 = vadd.f32 %v2495_v5, %v1562_v41 }
0x13c7   :  { %v1524_v26 = vpop.f32.mrf.mxu0 }
0x13c8   :  { %2251 = vtanh.f32 %v1567_v24  ;;  %v1834_v29 = vmul.f32 -1.442695, %v1567_v24 }
0x13c9   :  { %v2099_v55 = vpop.f32.mrf.mxu0  ;;  %2253 = vpow2.f32 %v1831_v30 }
0x13d5   :  { %v2252_v28 = vpop.eup %2251 }
0x13d6   :  { %1577 = vrot.lane.b32.xlu1 %v2252_v28, %s2281_s24  ;;  %v2254_v31 = vpop.eup %2253 }
0x13d7   :  { %v1459_v27 = vadd.f32 1.0, %v2254_v31 }
0x13d9   :  { %2255 = vrcp.f32 %v1459_v27 }
0x13da   :  { %2257 = vpow2.f32 %v1834_v29 }
0x13e6   :  { %v2256_v35 = vpop.eup %2255 }
0x13e7   :  { %v2258_v32 = vpop.eup %2257  ;;  %v1463_v14 = vmul.f32 %v2256_v35, %v2710_v59 }
0x13e8   :  { %v1571_v5 = vadd.f32 1.0, %v2258_v32 }
0x13ea   :  { %2259 = vrcp.f32 %v1571_v5 }
0x13f7   :  { %v2260_v34 = vpop.eup %2259 }
0x13f8   :  { %v1575_v43 = vmul.f32 %v2260_v34, %v2715_v54 }
0x1432   :  { %v1466_v36 = vpop.permute.xlu0 %1465 }
0x1433   :  { %v1468_v39 = vmul.f32 %v2256_v35, %v1466_v36 }
0x1435   :  { %1470 = vrot.lane.b32.xlu0 %v1468_v39, %s2282_s27 }
0x1448   :  { %v1578_v40 = vpop.permute.xlu1 %1577 }
0x1449   :  { %v1580_v42 = vmul.f32 %v2260_v34, %v1578_v40 }
0x144b   :  { %1582 = vrot.lane.b32.xlu1 %v1580_v42, %s2282_s27 }
0x14a7   :  { %v1471_v53 = vpop.permute.xlu0 %1470 }
0x14a8   :  { %v1473_v3 = vadd.f32 %v1471_v53, %v1463_v14 }
0x14aa   :  { %2261 = vtanh.f32 %v1473_v3 }
0x14b7   :  { %v2262_v33 = vpop.eup %2261 }
0x14b8   :  { %1476 = vrot.lane.b32.xlu0 %v2262_v33, %s2281_s24 }
0x14bd   :  { %v1583_v38 = vpop.permute.xlu1 %1582 }
0x14be   :  { %v1585_v44 = vadd.f32 %v1583_v38, %v1575_v43 }
0x14c0   :  { %2263 = vtanh.f32 %v1585_v44 }
0x14cd   :  { %v2264_v45 = vpop.eup %2263 }
0x14ce   :  { %1588 = vrot.lane.b32.xlu1 %v2264_v45, %s2281_s24 }
0x152a   :  { %v1477_v10 = vpop.permute.xlu0 %1476 }
0x152b   :  { %v1479_v46 = vmul.f32 %v2256_v35, %v1477_v10 }
0x152d   :  { %v1592_v47 = vpack.c.bf16 %v1479_v46, %v1479_v46 }
0x152f   :  { %1641 = vrot.lane.b32.xlu1 %v1592_v47, %s2282_s27 }
0x1540   :  { %v1589_v56 = vpop.permute.xlu1 %1588 }
0x1541   :  { %v1591_v49 = vmul.f32 %v2260_v34, %v1589_v56 }
0x1543   :  { %v1593_v52 = vpack.c.bf16 %v1591_v49, %v1591_v49 }
0x1545   :  { %1595 = vrot.lane.b32.xlu0 %v1593_v52, %s2282_s27 }
0x15a1   :  { %v1642_v57 = vpop.permute.xlu1 %1641 }
0x15a2   :  { %2121 = vmatmul.mubr.msk.bf16.vlgmr.msra.gmra.mxu1 %vm192_vm3, %v1642_v57 }
0x15b7   :  { %v1596_v58 = vpop.permute.xlu0 %1595 }
0x15b8   :  { %2113 = vmatmul.mubr.msk.bf16.vlgmr.msra.gmra.mxu0 %vm192_vm3, %v1596_v58 }
0x15b9   :  { %2128 = vmatprep.mubr.msk.bf16.mxu0 %vm2280_vm1, %v2279_v1  ;;  %2125 = vmatpush3.bf16.msra.mxu0 %v2143_v17 }
0x15ba   :  { %2126 = vmatprep.subr.bf16.mxu0 %v2279_v1 }
0x15bd   :  { %2127 = vmatpush3.bf16.msra.mxu0 %v2144_v18 }
0x1662   :  { %v1680_v59 = vpop.f32.mrf.mxu1 }
0x1664   :  { %v2122_v60 = vpop.f32.mrf.mxu1 }
0x1666   :  { %v1683_v61 = vpop.f32.mrf.mxu1 }
0x1668   :  { %v2123_v62 = vpop.f32.mrf.mxu1 }
0x1678   :  { %v1634_v54 = vpop.f32.mrf.mxu0 }
0x1679   :  { %v1681_v63 = vadd.f32 %v1680_v59, %v1634_v54 }
0x167a   :  { %v2114_v0 = vpop.f32.mrf.mxu0 }
0x167b   :  { %v1686_v4 = vadd.f32 %v2278_v2, %v1681_v63 }
0x167c   :  { %v1637_v6 = vpop.f32.mrf.mxu0 }
0x167d   :  { %2265 = vtanh.f32 %v1686_v4  ;;  %v1837_v8 = vmul.f32 -1.442695, %v1686_v4 }
0x167e   :  { %v2115_v51 = vpop.f32.mrf.mxu0 }
0x167f   :  { %2267 = vpow2.f32 %v1837_v8 }
0x168a   :  { %v2266_v7 = vpop.eup %2265 }
0x168b   :  { %1696 = vrot.lane.b32.xlu0 %v2266_v7, %s2281_s24 }
0x168c   :  { %v2268_v9 = vpop.eup %2267 }
0x168d   :  { %v1690_v11 = vadd.f32 1.0, %v2268_v9 }
0x168f   :  { %2269 = vrcp.f32 %v1690_v11 }
0x169c   :  { %v2270_v48 = vpop.eup %2269 }
0x169d   :  { %v1694_v13 = vmul.f32 %v2270_v48, %v1585_v44 }
0x16fd   :  { %v1697_v50 = vpop.permute.xlu0 %1696 }
0x16fe   :  { %v1699_v12 = vmul.f32 %v2270_v48, %v1697_v50 }
0x1700   :  { %1701 = vrot.lane.b32.xlu1 %v1699_v12, %s2282_s27 }
0x1772   :  { %v1702_v15 = vpop.permute.xlu1 %1701 }
0x1773   :  { %v1704_v16 = vadd.f32 %v1702_v15, %v1694_v13 }
0x1775   :  { %2271 = vtanh.f32 %v1704_v16 }
0x1782   :  { %v2272_v19 = vpop.eup %2271 }
0x1783   :  { %1707 = vrot.lane.b32.xlu0 %v2272_v19, %s2281_s24 }
0x17f5   :  { %v1708_v20 = vpop.permute.xlu0 %1707 }
0x17f6   :  { %v1710_v21 = vmul.f32 %v2270_v48, %v1708_v20 }
0x17f8   :  { %v1711_v22 = vpack.c.bf16 %v1710_v21, %v1710_v21 }
0x17fa   :  { %1724 = vrot.lane.b32.xlu1 %v1711_v22, %s2282_s27 }
0x186c   :  { %v1725_v23 = vpop.permute.xlu1 %1724 }
0x186d   :  { %2129 = vmatmul.mubr.msk.bf16.vlgmr.msra.gmra.mxu0 %vm192_vm3, %v1725_v23 }
0x192d   :  { %v1775_v41 = vpop.f32.mrf.mxu0 }
0x192e   :  { %v1776_v25 = vadd.f32 %v1838_v37, %v1775_v41 }
0x192f   :  { %v2130_v24 = vpop.f32.mrf.mxu0 }
0x1930   :  { %1781 = vst [vmem:[%s2798_s13] sm:$0xff] %v1776_v25 }
0x1931   :  { %v1778_v1 = vpop.f32.mrf.mxu0 }
0x1933   :  { %v2131_v26 = vpop.f32.mrf.mxu0 }

</bundles_post_ra>
